<compile_context>
chip_gen: v5e
topology: v5e:2x2
jax: 0.10.0
libtpu: 0.0.40
codegen_flags: <defaults>
</compile_context>

<pallas_src>
import functools

import jax
import jax.numpy as jnp
import numpy as np
from jax.experimental import pallas as pl
from jax.experimental.pallas import tpu as pltpu


LAST_CONV_DIM = 256   # get_last_conv_dim('alexnet')
FC1_SIZE = 64
FC1_KERNEL_SIZE = 6


def _round_up(x, m):
    return (x + m - 1) // m * m


def _mxu_tile_cap():
    """256-wide tiles suit v6e/v7x (256x256 MXU); v5e's MXU is 128x128."""
    try:
        info = pltpu.get_tpu_info()
        name = str(getattr(info, "chip_version", "") or "").lower()
        if "v5" in name or "5e" in name or "5p" in name:
            return 128
    except Exception:
        pass
    return 256


# ----------------------------------------------------------------------------
# Tiled matmul + bias (+ optional fused ReLU):  out = relu(A @ B + bias)
#   A: [Mp, Kp] (bf16/f32), B: [Kp, Np] pre-packed, bias: [1, Np] fp32.
#   fp32 VMEM accumulator, reduction axis innermost ("arbitrary").
# ----------------------------------------------------------------------------
def _matmul_bias_kernel(a_ref, b_ref, bias_ref, o_ref, acc_ref, *, apply_relu):
    k = pl.program_id(2)

    @pl.when(k == 0)
    def _():
        acc_ref[...] = jnp.zeros_like(acc_ref)

    acc_ref[...] += jnp.dot(a_ref[...], b_ref[...],
                            preferred_element_type=jnp.float32)

    @pl.when(k == pl.num_programs(2) - 1)
    def _():
        out = acc_ref[...] + bias_ref[...]
        if apply_relu:
            out = jnp.maximum(out, 0.0)
        o_ref[...] = out.astype(o_ref.dtype)


def _pick_tile(dim, candidates, cap):
    for t in candidates:
        if t <= cap and dim % t == 0:
            return t
    return dim   # single block covering the full (possibly unaligned) dim


def pallas_matmul_bias(a, b_packed, bias_packed, *, n_real, apply_relu):
    """a: [M, K] float, b_packed: [Kp, Np] pre-padded/cast, bias: [1, Np] fp32.
    Returns fp32 [M, n_real]."""
    M, K = a.shape
    Kp, Np = b_packed.shape
    assert K <= Kp and n_real <= Np

    cap = _mxu_tile_cap()
    Mp = _round_up(M, 128)
    tm = _pick_tile(Mp, (256, 128), cap)
    tn = _pick_tile(Np, (256, 128), cap)
    tk = _pick_tile(Kp, (512, 256, 128), 512)

    # v7x has 2 TensorCores: make sure there are >=2 parallel blocks if possible.
    if (Mp // tm) * (Np // tn) == 1:
        if Np > 128:
            tn = 128
        elif Mp > 128:
            tm = 128

    # Cast patches to the weight dtype (bf16 for the heavy layers) before the
    # HBM round-trip; pad M (and K only if the weight was K-padded).
    a_p = jnp.pad(a.astype(b_packed.dtype), ((0, Mp - M), (0, Kp - K)))

    grid = (Mp // tm, Np // tn, Kp // tk)
    out = pl.pallas_call(
        functools.partial(_matmul_bias_kernel, apply_relu=apply_relu),
        out_shape=jax.ShapeDtypeStruct((Mp, Np), jnp.float32),
        grid_spec=pltpu.PrefetchScalarGridSpec(
            num_scalar_prefetch=0,
            grid=grid,
            in_specs=[
                pl.BlockSpec((tm, tk), lambda i, j, k: (i, k)),
                pl.BlockSpec((tk, tn), lambda i, j, k: (k, j)),
                pl.BlockSpec((1, tn), lambda i, j, k: (0, j)),
            ],
            out_specs=pl.BlockSpec((tm, tn), lambda i, j, k: (i, j)),
            scratch_shapes=[pltpu.VMEM((tm, tn), jnp.float32)],
        ),
        compiler_params=pltpu.CompilerParams(
            dimension_semantics=("parallel", "parallel", "arbitrary")),
    )(a_p, b_packed, bias_packed)
    return out[:M, :n_real]


# ----------------------------------------------------------------------------
# im2col (NHWC) glue + conv wrapper around the Pallas matmul
# ----------------------------------------------------------------------------
def _im2col_nhwc(x, kh, kw, stride, padding):
    """x: [N, H, W, C] -> patches [N*Ho*Wo, kh*kw*C], column order (i, j, c)."""
    if padding:
        x = jnp.pad(x, ((0, 0), (padding, padding), (padding, padding), (0, 0)))
    N, Hp, Wp, C = x.shape
    Ho = (Hp - kh) // stride + 1
    Wo = (Wp - kw) // stride + 1
    cols = []
    for i in range(kh):
        for j in range(kw):
            cols.append(x[:, i:i + stride * Ho:stride, j:j + stride * Wo:stride, :])
    patches = jnp.concatenate(cols, axis=-1)          # [N, Ho, Wo, kh*kw*C]
    return patches.reshape(N * Ho * Wo, kh * kw * C), Ho, Wo
# TODO(synk): fc1's im2col is still materialized by XLA (now NHWC + bf16); a
# fully in-kernel shifted-window accumulation would cut A-side HBM traffic by
# another ~kh*kw factor.


def conv2d_nhwc(x, w_packed, bias_packed, n_real, *, kh, kw, stride=1,
                padding=0, relu=False):
    N = x.shape[0]
    patches, Ho, Wo = _im2col_nhwc(x, kh, kw, stride, padding)
    out = pallas_matmul_bias(patches, w_packed, bias_packed,
                             n_real=n_real, apply_relu=relu)
    return out.reshape(N, Ho, Wo, n_real)


# ----------------------------------------------------------------------------
# Fused fc2 (1x1 conv) + ReLU + rgb L2-normalize + spatial softmax + multiply
# ----------------------------------------------------------------------------
def _fc2_head_kernel(x_ref, wr_ref, wc_ref, br_ref, bc_ref, o_ref):
    x = x_ref[0]                                             # (HW, 64)
    rgb = jnp.maximum(
        jnp.dot(x, wr_ref[...], preferred_element_type=jnp.float32) + br_ref[...],
        0.0)                                                 # (HW, 3)
    conf = jnp.maximum(
        jnp.dot(x, wc_ref[...], preferred_element_type=jnp.float32) + bc_ref[...],
        0.0)                                                 # (HW, 1)
    # F.normalize(p=2, dim=channel): v / max(||v||_2, 1e-12)  (EUP rsqrt)
    ss = jnp.sum(rgb * rgb, axis=-1, keepdims=True)
    rgb = rgb * jax.lax.rsqrt(jnp.maximum(ss, 1e-24))
    # softmax of confidence over the flattened spatial dim (EUP approx recip)
    m = jnp.max(conf, axis=0, keepdims=True)
    e = jnp.exp(conf - m)
    denom = jnp.sum(e, axis=0, keepdims=True)
    o_ref[0] = rgb * (e * pl.reciprocal(denom, approx=True))


def fused_fc2_head(y, w_rgb, w_conf, b_rgb, b_conf):
    """y: [N, HW, 64] -> [N, HW, 3]."""
    N, HW, C = y.shape
    return pl.pallas_call(
        _fc2_head_kernel,
        out_shape=jax.ShapeDtypeStruct((N, HW, 3), jnp.float32),
        grid=(N,),
        in_specs=[pl.BlockSpec((1, HW, C), lambda n: (n, 0, 0)),
                  pl.BlockSpec((C, 3), lambda n: (0, 0)),
                  pl.BlockSpec((C, 1), lambda n: (0, 0)),
                  pl.BlockSpec((1, 3), lambda n: (0, 0)),
                  pl.BlockSpec((1, 1), lambda n: (0, 0))],
        out_specs=pl.BlockSpec((1, HW, 3), lambda n: (n, 0, 0)),
        compiler_params=pltpu.CompilerParams(dimension_semantics=("parallel",)),
    )(y, w_rgb, w_conf, b_rgb, b_conf)


# ----------------------------------------------------------------------------
# Fused fc_pool (8x8 conv, 3->3) + ReLU + bilinear resize (as a dense matmul)
# ----------------------------------------------------------------------------
def _pool_resize_kernel(p_ref, wp_ref, bp_ref, wr_ref, o_ref):
    p = p_ref[0]                                             # (Po, 192)
    z = jnp.dot(p, wp_ref[...], preferred_element_type=jnp.float32) + bp_ref[...]
    z = jnp.maximum(z, 0.0)                                  # fc_pool + ReLU, (Po, 3)
    # bilinear(align_corners=False) upsample == dense linear map over (ho, wo)
    o_ref[0] = jnp.dot(wr_ref[...], z, preferred_element_type=jnp.float32)


def fused_pool_resize(patches, wp, bp, wr):
    """patches: [N, Po, K2], wr: [H*W, Po] -> [N, H*W, 3]."""
    N, Po, K2 = patches.shape
    HWout = wr.shape[0]
    return pl.pallas_call(
        _pool_resize_kernel,
        out_shape=jax.ShapeDtypeStruct((N, HWout, 3), jnp.float32),
        grid=(N,),
        in_specs=[pl.BlockSpec((1, Po, K2), lambda n: (n, 0, 0)),
                  pl.BlockSpec((K2, 3), lambda n: (0, 0)),
                  pl.BlockSpec((1, 3), lambda n: (0, 0)),
                  pl.BlockSpec((HWout, Po), lambda n: (0, 0))],
        out_specs=pl.BlockSpec((1, HWout, 3), lambda n: (n, 0, 0)),
        compiler_params=pltpu.CompilerParams(dimension_semantics=("parallel",)),
    )(patches, wp, bp, wr)


def _bilinear_matrix(out_size, in_size):
    """PyTorch F.interpolate(mode='bilinear', align_corners=False) along one
    axis, as a dense (out_size, in_size) matrix (numpy -> trace-time const)."""
    scale = in_size / out_size
    s = (np.arange(out_size, dtype=np.float64) + 0.5) * scale - 0.5
    s = np.maximum(s, 0.0)
    i0 = np.minimum(np.floor(s).astype(np.int64), in_size - 1)
    i1 = np.minimum(i0 + 1, in_size - 1)
    w1 = (s - i0).astype(np.float32)
    w0 = 1.0 - w1
    mat = np.zeros((out_size, in_size), np.float32)
    mat[np.arange(out_size), i0] += w0
    mat[np.arange(out_size), i1] += w1
    return mat


# ----------------------------------------------------------------------------
# Parameters (deterministic synthetic init; shapes follow the module __init__)
# ----------------------------------------------------------------------------
def init_params(key):
    ks = jax.random.split(key, 7)

    def conv_w(k, cout, cin, kh, kw):
        fan_in = cin * kh * kw
        return jax.random.normal(k, (cout, cin, kh, kw), jnp.float32) / jnp.sqrt(fan_in)

    return {
        # TODO(synk): get_backbone('alexnet') is external to the module source;
        # a deterministic single strided conv producing last_conv_dim=256
        # channels stands in for the AlexNet feature extractor.
        "backbone_w": conv_w(ks[0], LAST_CONV_DIM, 3, 3, 3),
        "backbone_b": 0.01 * jax.random.normal(ks[1], (LAST_CONV_DIM,), jnp.float32),
        "fc1_w": conv_w(ks[2], FC1_SIZE, LAST_CONV_DIM, FC1_KERNEL_SIZE, FC1_KERNEL_SIZE),
        "fc2_w": conv_w(ks[3], 4, FC1_SIZE, 1, 1),
        "fc2_b": 0.01 * jax.random.normal(ks[4], (4,), jnp.float32),
        "fc_pool_w": conv_w(ks[5], 3, 3, 8, 8),
        "fc_pool_b": 0.01 * jax.random.normal(ks[6], (3,), jnp.float32),
    }


def _pack_matmul_weight(w, dtype):
    """[Cout, Cin, kh, kw] -> [Kp, Np], K ordered (kh, kw, Cin) to match the
    NHWC im2col columns. K is padded only when it will be K-tiled (K > 512)."""
    cout, cin, kh, kw = w.shape
    wm = jnp.transpose(w, (2, 3, 1, 0)).reshape(kh * kw * cin, cout)
    K, Nn = wm.shape
    Kp = _round_up(K, 128) if K > 512 else K
    Np = _round_up(Nn, 128)
    return jnp.pad(wm, ((0, Kp - K), (0, Np - Nn))).astype(dtype)


def _pack_bias(b, cout):
    Np = _round_up(cout, 128)
    b = jnp.zeros((cout,), jnp.float32) if b is None else b.astype(jnp.float32)
    return jnp.pad(b, (0, Np - cout)).reshape(1, Np)


def prepare_params(params):
    """Pack / pad / cast weights once, OUTSIDE the jitted forward."""
    fc2_w = jnp.transpose(params["fc2_w"], (2, 3, 1, 0)).reshape(FC1_SIZE, 4)
    pool_w = jnp.transpose(params["fc_pool_w"], (2, 3, 1, 0)).reshape(8 * 8 * 3, 3)
    return {
        # FLOP-heavy conv layers: bf16 MXU inputs, fp32 accumulate in-kernel.
        "backbone_w": _pack_matmul_weight(params["backbone_w"], jnp.bfloat16),
        "backbone_b": _pack_bias(params["backbone_b"], LAST_CONV_DIM),
        "fc1_w": _pack_matmul_weight(params["fc1_w"], jnp.bfloat16),
        "fc1_b": _pack_bias(None, FC1_SIZE),
        # Tiny tail layers: fp32, fused into dedicated per-batch kernels.
        "fc2_w_rgb": fc2_w[:, :3],
        "fc2_w_conf": fc2_w[:, 3:4],
        "fc2_b_rgb": params["fc2_b"][:3].reshape(1, 3).astype(jnp.float32),
        "fc2_b_conf": params["fc2_b"][3:4].reshape(1, 1).astype(jnp.float32),
        "fc_pool_w": pool_w.astype(jnp.float32),
        "fc_pool_b": params["fc_pool_b"].reshape(1, 3).astype(jnp.float32),
    }


# ----------------------------------------------------------------------------
# Forward pass (matches CC_Alex_FCN4.forward_template, inference mode)
# ----------------------------------------------------------------------------
def cc_alex_fcn4_forward(prep, x):
    """x: [N, 3, H, W] (NCHW, like the PyTorch module) -> [N, 3, H, W]."""
    N, _, H_in, W_in = x.shape
    xh = jnp.transpose(x, (0, 2, 3, 1))                       # NHWC

    # backbone stand-in (3 -> 256, k=3, stride 2, pad 1) + ReLU
    y = conv2d_nhwc(xh, prep["backbone_w"], prep["backbone_b"], LAST_CONV_DIM,
                    kh=3, kw=3, stride=2, padding=1, relu=True)
    # fc1: Conv2d(256, 64, k=6, pad=3, bias=False) + ReLU; Dropout(0.5) = id
    y = conv2d_nhwc(y, prep["fc1_w"], prep["fc1_b"], FC1_SIZE,
                    kh=FC1_KERNEL_SIZE, kw=FC1_KERNEL_SIZE, stride=1, padding=3,
                    relu=True)
    _, Ho, Wo, _ = y.shape

    # fc2 (1x1) + ReLU + rgb L2-normalize + spatial softmax(confidence) + mult
    rgb = fused_fc2_head(y.reshape(N, Ho * Wo, FC1_SIZE),
                         prep["fc2_w_rgb"], prep["fc2_w_conf"],
                         prep["fc2_b_rgb"], prep["fc2_b_conf"])   # [N, Ho*Wo, 3]
    rgb = rgb.reshape(N, Ho, Wo, 3)

    # fc_pool (8x8, 3->3) + ReLU + bilinear(align_corners=False) resize fused
    patches, Ho2, Wo2 = _im2col_nhwc(rgb, 8, 8, 1, 0)             # [N*Ho2*Wo2, 192]
    patches = patches.reshape(N, Ho2 * Wo2, 8 * 8 * 3)
    wr = jnp.asarray(np.kron(_bilinear_matrix(H_in, Ho2),
                             _bilinear_matrix(W_in, Wo2)))        # [H*W, Ho2*Wo2]
    out = fused_pool_resize(patches, prep["fc_pool_w"], prep["fc_pool_b"], wr)
    # (the torch module's debug `print(rgb)` is intentionally omitted)
    return jnp.transpose(out.reshape(N, H_in, W_in, 3), (0, 3, 1, 2))


if __name__ == "__main__":
    key = jax.random.PRNGKey(0)
    pkey, xkey = jax.random.split(key)
    params = init_params(pkey)
    prep = prepare_params(params)        # one-time weight packing, outside jit

    # input: NCHW RGB image batch (spatial chosen so fc2 output is >= 8x8)
    x = jax.random.normal(xkey, (2, 3, 16, 16), jnp.float32)

    fwd = jax.jit(functools.partial(cc_alex_fcn4_forward, prep))
    out = jax.block_until_ready(fwd(x))
    assert out.shape == (2, 3, 16, 16), out.shape
    assert bool(jnp.all(jnp.isfinite(out)))
    print("KERNEL_OK")
</pallas_src>

<mosaic_0001>
module attributes {stable_mosaic.version = 11 : i64} {
  func.func @_matmul_bias_kernel(%arg0: i32, %arg1: i32, %arg2: i32, %arg3: memref<128x27xbf16, #tpu.memory_space<vmem>>, %arg4: memref<27x128xbf16, #tpu.memory_space<vmem>>, %arg5: memref<1x128xf32, #tpu.memory_space<vmem>>, %arg6: memref<128x128xf32, #tpu.memory_space<vmem>>, %arg7: memref<128x128xf32, #tpu.memory_space<vmem>>) attributes {dimension_semantics = [#tpu.dimension_semantics<parallel>, #tpu.dimension_semantics<parallel>, #tpu.dimension_semantics<arbitrary>], iteration_bounds = array<i64: 1, 2, 1>, scalar_prefetch = 0 : i64, scratch_operands = 1 : i64, tpu.core_type = #tpu.core_type<tc>, window_params = [{transform_indices = @transform_0, window_bounds = array<i64: 128, 27>}, {transform_indices = @transform_1, window_bounds = array<i64: 27, 128>}, {transform_indices = @transform_2, window_bounds = array<i64: 1, 128>}, {transform_indices = @transform_3, window_bounds = array<i64: 128, 128>}]} {
    %c0_i32 = arith.constant 0 : i32
    %0 = arith.cmpi eq, %arg2, %c0_i32 : i32
    %1 = arith.extui %0 : i1 to i32
    %c0_i32_0 = arith.constant 0 : i32
    %2 = arith.cmpi ne, %1, %c0_i32_0 : i32
    scf.if %2 {
      %cst_10 = arith.constant 0.000000e+00 : f32
      %12 = vector.broadcast %cst_10 : f32 to vector<128x128xf32>
      %c0_11 = arith.constant 0 : index
      %c0_12 = arith.constant 0 : index
      %13 = vector.load %arg7[%c0_11, %c0_12] : memref<128x128xf32, #tpu.memory_space<vmem>>, vector<128x128xf32>
      tpu.vector_store %arg7[%c0_11, %c0_12], %12 {strides = array<i32>} : memref<128x128xf32, #tpu.memory_space<vmem>>, vector<128x128xf32>,
    } else {
    }
    %c0 = arith.constant 0 : index
    %c0_1 = arith.constant 0 : index
    %3 = vector.load %arg7[%c0, %c0_1] : memref<128x128xf32, #tpu.memory_space<vmem>>, vector<128x128xf32>
    %c0_2 = arith.constant 0 : index
    %c0_3 = arith.constant 0 : index
    %4 = vector.load %arg3[%c0_2, %c0_3] : memref<128x27xbf16, #tpu.memory_space<vmem>>, vector<128x27xbf16>
    %c0_4 = arith.constant 0 : index
    %c0_5 = arith.constant 0 : index
    %5 = vector.load %arg4[%c0_4, %c0_5] : memref<27x128xbf16, #tpu.memory_space<vmem>>, vector<27x128xbf16>
    %cst = arith.constant dense<0.000000e+00> : vector<128x128xf32>
    %6 = tpu.matmul %4, %5, %cst {dimension_numbers = #tpu.dot_dimension_numbers<[1], [0], [0], [1], [0, 0, 1, 1], [], []>} : vector<128x27xbf16>, vector<27x128xbf16>, vector<128x128xf32> -> vector<128x128xf32>
    %7 = arith.addf %3, %6 : vector<128x128xf32>
    %c0_6 = arith.constant 0 : index
    %c0_7 = arith.constant 0 : index
    %8 = vector.load %arg7[%c0_6, %c0_7] : memref<128x128xf32, #tpu.memory_space<vmem>>, vector<128x128xf32>
    tpu.vector_store %arg7[%c0_6, %c0_7], %7 {strides = array<i32>} : memref<128x128xf32, #tpu.memory_space<vmem>>, vector<128x128xf32>,
    %c0_i32_8 = arith.constant 0 : i32
    %9 = arith.cmpi eq, %arg2, %c0_i32_8 : i32
    %10 = arith.extui %9 : i1 to i32
    %c0_i32_9 = arith.constant 0 : i32
    %11 = arith.cmpi ne, %10, %c0_i32_9 : i32
    scf.if %11 {
      %c0_10 = arith.constant 0 : index
      %c0_11 = arith.constant 0 : index
      %12 = vector.load %arg7[%c0_10, %c0_11] : memref<128x128xf32, #tpu.memory_space<vmem>>, vector<128x128xf32>
      %c0_12 = arith.constant 0 : index
      %c0_13 = arith.constant 0 : index
      %13 = vector.load %arg5[%c0_12, %c0_13] : memref<1x128xf32, #tpu.memory_space<vmem>>, vector<1x128xf32>
      %14 = vector.broadcast %13 : vector<1x128xf32> to vector<128x128xf32>
      %15 = arith.addf %12, %14 : vector<128x128xf32>
      %cst_14 = arith.constant 0.000000e+00 : f32
      %16 = vector.broadcast %cst_14 : f32 to vector<128x128xf32>
      %17 = arith.maximumf %15, %16 : vector<128x128xf32>
      %c0_15 = arith.constant 0 : index
      %c0_16 = arith.constant 0 : index
      %18 = vector.load %arg6[%c0_15, %c0_16] : memref<128x128xf32, #tpu.memory_space<vmem>>, vector<128x128xf32>
      tpu.vector_store %arg6[%c0_15, %c0_16], %17 {strides = array<i32>} : memref<128x128xf32, #tpu.memory_space<vmem>>, vector<128x128xf32>,
    } else {
    }
    return
  }
  func.func @transform_0(%arg0: i32, %arg1: i32, %arg2: i32) -> (i32, i32) {
    %c0_i32 = arith.constant 0 : i32
    return %arg0, %arg2 : i32, i32
  }
  func.func @transform_1(%arg0: i32, %arg1: i32, %arg2: i32) -> (i32, i32) {
    %c0_i32 = arith.constant 0 : i32
    return %arg2, %arg1 : i32, i32
  }
  func.func @transform_2(%arg0: i32, %arg1: i32, %arg2: i32) -> (i32, i32) {
    %c0_i32 = arith.constant 0 : i32
    %c0_i32_0 = arith.constant 0 : i32
    return %c0_i32, %arg1 : i32, i32
  }
  func.func @transform_3(%arg0: i32, %arg1: i32, %arg2: i32) -> (i32, i32) {
    %c0_i32 = arith.constant 0 : i32
    return %arg0, %arg1 : i32, i32
  }
}

module attributes {stable_mosaic.version = 11 : i64} {
  func.func @_matmul_bias_kernel(%arg0: i32, %arg1: i32, %arg2: i32, %arg3: memref<128x512xbf16, #tpu.memory_space<vmem>>, %arg4: memref<512x128xbf16, #tpu.memory_space<vmem>>, %arg5: memref<1x128xf32, #tpu.memory_space<vmem>>, %arg6: memref<128x128xf32, #tpu.memory_space<vmem>>, %arg7: memref<128x128xf32, #tpu.memory_space<vmem>>) attributes {dimension_semantics = [#tpu.dimension_semantics<parallel>, #tpu.dimension_semantics<parallel>, #tpu.dimension_semantics<arbitrary>], iteration_bounds = array<i64: 2, 1, 18>, scalar_prefetch = 0 : i64, scratch_operands = 1 : i64, tpu.core_type = #tpu.core_type<tc>, window_params = [{transform_indices = @transform_0, window_bounds = array<i64: 128, 512>}, {transform_indices = @transform_1, window_bounds = array<i64: 512, 128>}, {transform_indices = @transform_2, window_bounds = array<i64: 1, 128>}, {transform_indices = @transform_3, window_bounds = array<i64: 128, 128>}]} {
    %c0_i32 = arith.constant 0 : i32
    %0 = arith.cmpi eq, %arg2, %c0_i32 : i32
    %1 = arith.extui %0 : i1 to i32
    %c0_i32_0 = arith.constant 0 : i32
    %2 = arith.cmpi ne, %1, %c0_i32_0 : i32
    scf.if %2 {
      %cst_9 = arith.constant 0.000000e+00 : f32
      %12 = vector.broadcast %cst_9 : f32 to vector<128x128xf32>
      %c0_10 = arith.constant 0 : index
      %c0_11 = arith.constant 0 : index
      %13 = vector.load %arg7[%c0_10, %c0_11] : memref<128x128xf32, #tpu.memory_space<vmem>>, vector<128x128xf32>
      tpu.vector_store %arg7[%c0_10, %c0_11], %12 {strides = array<i32>} : memref<128x128xf32, #tpu.memory_space<vmem>>, vector<128x128xf32>,
    } else {
    }
    %c0 = arith.constant 0 : index
    %c0_1 = arith.constant 0 : index
    %3 = vector.load %arg7[%c0, %c0_1] : memref<128x128xf32, #tpu.memory_space<vmem>>, vector<128x128xf32>
    %c0_2 = arith.constant 0 : index
    %c0_3 = arith.constant 0 : index
    %4 = vector.load %arg3[%c0_2, %c0_3] : memref<128x512xbf16, #tpu.memory_space<vmem>>, vector<128x512xbf16>
    %c0_4 = arith.constant 0 : index
    %c0_5 = arith.constant 0 : index
    %5 = vector.load %arg4[%c0_4, %c0_5] : memref<512x128xbf16, #tpu.memory_space<vmem>>, vector<512x128xbf16>
    %cst = arith.constant dense<0.000000e+00> : vector<128x128xf32>
    %6 = tpu.matmul %4, %5, %cst {dimension_numbers = #tpu.dot_dimension_numbers<[1], [0], [0], [1], [0, 0, 1, 1], [], []>} : vector<128x512xbf16>, vector<512x128xbf16>, vector<128x128xf32> -> vector<128x128xf32>
    %7 = arith.addf %3, %6 : vector<128x128xf32>
    %c0_6 = arith.constant 0 : index
    %c0_7 = arith.constant 0 : index
    %8 = vector.load %arg7[%c0_6, %c0_7] : memref<128x128xf32, #tpu.memory_space<vmem>>, vector<128x128xf32>
    tpu.vector_store %arg7[%c0_6, %c0_7], %7 {strides = array<i32>} : memref<128x128xf32, #tpu.memory_space<vmem>>, vector<128x128xf32>,
    %c17_i32 = arith.constant 17 : i32
    %9 = arith.cmpi eq, %arg2, %c17_i32 : i32
    %10 = arith.extui %9 : i1 to i32
    %c0_i32_8 = arith.constant 0 : i32
    %11 = arith.cmpi ne, %10, %c0_i32_8 : i32
    scf.if %11 {
      %c0_9 = arith.constant 0 : index
      %c0_10 = arith.constant 0 : index
      %12 = vector.load %arg7[%c0_9, %c0_10] : memref<128x128xf32, #tpu.memory_space<vmem>>, vector<128x128xf32>
      %c0_11 = arith.constant 0 : index
      %c0_12 = arith.constant 0 : index
      %13 = vector.load %arg5[%c0_11, %c0_12] : memref<1x128xf32, #tpu.memory_space<vmem>>, vector<1x128xf32>
      %14 = vector.broadcast %13 : vector<1x128xf32> to vector<128x128xf32>
      %15 = arith.addf %12, %14 : vector<128x128xf32>
      %cst_13 = arith.constant 0.000000e+00 : f32
      %16 = vector.broadcast %cst_13 : f32 to vector<128x128xf32>
      %17 = arith.maximumf %15, %16 : vector<128x128xf32>
      %c0_14 = arith.constant 0 : index
      %c0_15 = arith.constant 0 : index
      %18 = vector.load %arg6[%c0_14, %c0_15] : memref<128x128xf32, #tpu.memory_space<vmem>>, vector<128x128xf32>
      tpu.vector_store %arg6[%c0_14, %c0_15], %17 {strides = array<i32>} : memref<128x128xf32, #tpu.memory_space<vmem>>, vector<128x128xf32>,
    } else {
    }
    return
  }
  func.func @transform_0(%arg0: i32, %arg1: i32, %arg2: i32) -> (i32, i32) {
    %c0_i32 = arith.constant 0 : i32
    return %arg0, %arg2 : i32, i32
  }
  func.func @transform_1(%arg0: i32, %arg1: i32, %arg2: i32) -> (i32, i32) {
    %c0_i32 = arith.constant 0 : i32
    return %arg2, %arg1 : i32, i32
  }
  func.func @transform_2(%arg0: i32, %arg1: i32, %arg2: i32) -> (i32, i32) {
    %c0_i32 = arith.constant 0 : i32
    %c0_i32_0 = arith.constant 0 : i32
    return %c0_i32, %arg1 : i32, i32
  }
  func.func @transform_3(%arg0: i32, %arg1: i32, %arg2: i32) -> (i32, i32) {
    %c0_i32 = arith.constant 0 : i32
    return %arg0, %arg1 : i32, i32
  }
}

module attributes {stable_mosaic.version = 11 : i64} {
  func.func @_fc2_head_kernel(%arg0: i32, %arg1: memref<1x81x64xf32, #tpu.memory_space<vmem>>, %arg2: memref<64x3xf32, #tpu.memory_space<vmem>>, %arg3: memref<64x1xf32, #tpu.memory_space<vmem>>, %arg4: memref<1x3xf32, #tpu.memory_space<vmem>>, %arg5: memref<1x1xf32, #tpu.memory_space<vmem>>, %arg6: memref<1x81x3xf32, #tpu.memory_space<vmem>>) attributes {dimension_semantics = [#tpu.dimension_semantics<parallel>], iteration_bounds = array<i64: 2>, scalar_prefetch = 0 : i64, scratch_operands = 0 : i64, tpu.core_type = #tpu.core_type<tc>, window_params = [{transform_indices = @transform_0, window_bounds = array<i64: 1, 81, 64>}, {pipeline_mode = #tpu.pipeline_mode<synchronous>, transform_indices = @transform_1, window_bounds = array<i64: 64, 3>}, {pipeline_mode = #tpu.pipeline_mode<synchronous>, transform_indices = @transform_2, window_bounds = array<i64: 64, 1>}, {pipeline_mode = #tpu.pipeline_mode<synchronous>, transform_indices = @transform_3, window_bounds = array<i64: 1, 3>}, {pipeline_mode = #tpu.pipeline_mode<synchronous>, transform_indices = @transform_4, window_bounds = array<i64: 1, 1>}, {transform_indices = @transform_5, window_bounds = array<i64: 1, 81, 3>}]} {
    %c0 = arith.constant 0 : index
    %c0_0 = arith.constant 0 : index
    %c0_1 = arith.constant 0 : index
    %0 = vector.load %arg1[%c0, %c0_0, %c0_1] : memref<1x81x64xf32, #tpu.memory_space<vmem>>, vector<1x81x64xf32>
    %1 = vector.shape_cast %0 : vector<1x81x64xf32> to vector<81x64xf32>
    %c0_2 = arith.constant 0 : index
    %c0_3 = arith.constant 0 : index
    %2 = vector.load %arg2[%c0_2, %c0_3] : memref<64x3xf32, #tpu.memory_space<vmem>>, vector<64x3xf32>
    %cst = arith.constant dense<0.000000e+00> : vector<81x3xf32>
    %3 = tpu.matmul %1, %2, %cst {dimension_numbers = #tpu.dot_dimension_numbers<[1], [0], [0], [1], [0, 0, 1, 1], [], []>} : vector<81x64xf32>, vector<64x3xf32>, vector<81x3xf32> -> vector<81x3xf32>
    %c0_4 = arith.constant 0 : index
    %c0_5 = arith.constant 0 : index
    %4 = vector.load %arg4[%c0_4, %c0_5] : memref<1x3xf32, #tpu.memory_space<vmem>>, vector<1x3xf32>
    %5 = vector.broadcast %4 : vector<1x3xf32> to vector<81x3xf32>
    %6 = arith.addf %3, %5 : vector<81x3xf32>
    %cst_6 = arith.constant 0.000000e+00 : f32
    %7 = vector.broadcast %cst_6 : f32 to vector<81x3xf32>
    %8 = arith.maximumf %6, %7 : vector<81x3xf32>
    %c0_7 = arith.constant 0 : index
    %c0_8 = arith.constant 0 : index
    %9 = vector.load %arg3[%c0_7, %c0_8] : memref<64x1xf32, #tpu.memory_space<vmem>>, vector<64x1xf32>
    %cst_9 = arith.constant dense<0.000000e+00> : vector<81x1xf32>
    %10 = tpu.matmul %1, %9, %cst_9 {dimension_numbers = #tpu.dot_dimension_numbers<[1], [0], [0], [1], [0, 0, 1, 1], [], []>} : vector<81x64xf32>, vector<64x1xf32>, vector<81x1xf32> -> vector<81x1xf32>
    %c0_10 = arith.constant 0 : index
    %c0_11 = arith.constant 0 : index
    %11 = vector.load %arg5[%c0_10, %c0_11] : memref<1x1xf32, #tpu.memory_space<vmem>>, vector<1x1xf32>
    %12 = vector.broadcast %11 : vector<1x1xf32> to vector<81x1xf32>
    %13 = arith.addf %10, %12 : vector<81x1xf32>
    %cst_12 = arith.constant 0.000000e+00 : f32
    %14 = vector.broadcast %cst_12 : f32 to vector<81x1xf32>
    %15 = arith.maximumf %13, %14 : vector<81x1xf32>
    %16 = arith.mulf %8, %8 : vector<81x3xf32>
    %cst_13 = arith.constant dense<0.000000e+00> : vector<81xf32>
    %17 = vector.multi_reduction <add>, %16, %cst_13 [1] : vector<81x3xf32> to vector<81xf32>
    %18 = vector.shape_cast %17 : vector<81xf32> to vector<81x1xf32>
    %cst_14 = arith.constant 1.000000e-24 : f32
    %19 = vector.broadcast %cst_14 : f32 to vector<81x1xf32>
    %20 = arith.maximumf %18, %19 : vector<81x1xf32>
    %21 = math.rsqrt %20 : vector<81x1xf32>
    %22 = vector.broadcast %21 : vector<81x1xf32> to vector<81x3xf32>
    %23 = arith.mulf %8, %22 : vector<81x3xf32>
    %cst_15 = arith.constant dense<0xFF800000> : vector<1xf32>
    %24 = vector.multi_reduction <maximumf>, %15, %cst_15 [0] : vector<81x1xf32> to vector<1xf32>
    %25 = vector.shape_cast %24 : vector<1xf32> to vector<1x1xf32>
    %26 = vector.broadcast %25 : vector<1x1xf32> to vector<81x1xf32>
    %27 = arith.subf %15, %26 : vector<81x1xf32>
    %28 = math.exp %27 : vector<81x1xf32>
    %cst_16 = arith.constant dense<0.000000e+00> : vector<1xf32>
    %29 = vector.multi_reduction <add>, %28, %cst_16 [0] : vector<81x1xf32> to vector<1xf32>
    %30 = vector.shape_cast %29 : vector<1xf32> to vector<1x1xf32>
    %31 = tpu.reciprocal %30 {approx = true} : vector<1x1xf32> -> vector<1x1xf32>
    %32 = vector.broadcast %31 : vector<1x1xf32> to vector<81x1xf32>
    %33 = arith.mulf %28, %32 : vector<81x1xf32>
    %34 = vector.broadcast %33 : vector<81x1xf32> to vector<81x3xf32>
    %35 = arith.mulf %23, %34 : vector<81x3xf32>
    %c0_17 = arith.constant 0 : index
    %c0_18 = arith.constant 0 : index
    %c0_19 = arith.constant 0 : index
    %36 = vector.load %arg6[%c0_17, %c0_18, %c0_19] : memref<1x81x3xf32, #tpu.memory_space<vmem>>, vector<1x81x3xf32>
    %37 = vector.shape_cast %36 : vector<1x81x3xf32> to vector<81x3xf32>
    %38 = vector.shape_cast %35 : vector<81x3xf32> to vector<1x81x3xf32>
    tpu.vector_store %arg6[%c0_17, %c0_18, %c0_19], %38 {strides = array<i32>} : memref<1x81x3xf32, #tpu.memory_space<vmem>>, vector<1x81x3xf32>,
    return
  }
  func.func @transform_0(%arg0: i32) -> (i32, i32, i32) {
    %c0_i32 = arith.constant 0 : i32
    %c0_i32_0 = arith.constant 0 : i32
    %c0_i32_1 = arith.constant 0 : i32
    return %arg0, %c0_i32, %c0_i32_0 : i32, i32, i32
  }
  func.func @transform_1(%arg0: i32) -> (i32, i32) {
    %c0_i32 = arith.constant 0 : i32
    %c0_i32_0 = arith.constant 0 : i32
    %c0_i32_1 = arith.constant 0 : i32
    return %c0_i32, %c0_i32_0 : i32, i32
  }
  func.func @transform_2(%arg0: i32) -> (i32, i32) {
    %c0_i32 = arith.constant 0 : i32
    %c0_i32_0 = arith.constant 0 : i32
    %c0_i32_1 = arith.constant 0 : i32
    return %c0_i32, %c0_i32_0 : i32, i32
  }
  func.func @transform_3(%arg0: i32) -> (i32, i32) {
    %c0_i32 = arith.constant 0 : i32
    %c0_i32_0 = arith.constant 0 : i32
    %c0_i32_1 = arith.constant 0 : i32
    return %c0_i32, %c0_i32_0 : i32, i32
  }
  func.func @transform_4(%arg0: i32) -> (i32, i32) {
    %c0_i32 = arith.constant 0 : i32
    %c0_i32_0 = arith.constant 0 : i32
    %c0_i32_1 = arith.constant 0 : i32
    return %c0_i32, %c0_i32_0 : i32, i32
  }
  func.func @transform_5(%arg0: i32) -> (i32, i32, i32) {
    %c0_i32 = arith.constant 0 : i32
    %c0_i32_0 = arith.constant 0 : i32
    %c0_i32_1 = arith.constant 0 : i32
    return %arg0, %c0_i32, %c0_i32_0 : i32, i32, i32
  }
}

module attributes {stable_mosaic.version = 11 : i64} {
  func.func @_pool_resize_kernel(%arg0: i32, %arg1: memref<1x4x192xf32, #tpu.memory_space<vmem>>, %arg2: memref<192x3xf32, #tpu.memory_space<vmem>>, %arg3: memref<1x3xf32, #tpu.memory_space<vmem>>, %arg4: memref<256x4xf32, #tpu.memory_space<vmem>>, %arg5: memref<1x256x3xf32, #tpu.memory_space<vmem>>) attributes {dimension_semantics = [#tpu.dimension_semantics<parallel>], iteration_bounds = array<i64: 2>, scalar_prefetch = 0 : i64, scratch_operands = 0 : i64, tpu.core_type = #tpu.core_type<tc>, window_params = [{transform_indices = @transform_0, window_bounds = array<i64: 1, 4, 192>}, {pipeline_mode = #tpu.pipeline_mode<synchronous>, transform_indices = @transform_1, window_bounds = array<i64: 192, 3>}, {pipeline_mode = #tpu.pipeline_mode<synchronous>, transform_indices = @transform_2, window_bounds = array<i64: 1, 3>}, {pipeline_mode = #tpu.pipeline_mode<synchronous>, transform_indices = @transform_3, window_bounds = array<i64: 256, 4>}, {transform_indices = @transform_4, window_bounds = array<i64: 1, 256, 3>}]} {
    %c0 = arith.constant 0 : index
    %c0_0 = arith.constant 0 : index
    %c0_1 = arith.constant 0 : index
    %0 = vector.load %arg1[%c0, %c0_0, %c0_1] : memref<1x4x192xf32, #tpu.memory_space<vmem>>, vector<1x4x192xf32>
    %1 = vector.shape_cast %0 : vector<1x4x192xf32> to vector<4x192xf32>
    %c0_2 = arith.constant 0 : index
    %c0_3 = arith.constant 0 : index
    %2 = vector.load %arg2[%c0_2, %c0_3] : memref<192x3xf32, #tpu.memory_space<vmem>>, vector<192x3xf32>
    %cst = arith.constant dense<0.000000e+00> : vector<4x3xf32>
    %3 = tpu.matmul %1, %2, %cst {dimension_numbers = #tpu.dot_dimension_numbers<[1], [0], [0], [1], [0, 0, 1, 1], [], []>} : vector<4x192xf32>, vector<192x3xf32>, vector<4x3xf32> -> vector<4x3xf32>
    %c0_4 = arith.constant 0 : index
    %c0_5 = arith.constant 0 : index
    %4 = vector.load %arg3[%c0_4, %c0_5] : memref<1x3xf32, #tpu.memory_space<vmem>>, vector<1x3xf32>
    %5 = vector.broadcast %4 : vector<1x3xf32> to vector<4x3xf32>
    %6 = arith.addf %3, %5 : vector<4x3xf32>
    %cst_6 = arith.constant 0.000000e+00 : f32
    %7 = vector.broadcast %cst_6 : f32 to vector<4x3xf32>
    %8 = arith.maximumf %6, %7 : vector<4x3xf32>
    %c0_7 = arith.constant 0 : index
    %c0_8 = arith.constant 0 : index
    %9 = vector.load %arg4[%c0_7, %c0_8] : memref<256x4xf32, #tpu.memory_space<vmem>>, vector<256x4xf32>
    %cst_9 = arith.constant dense<0.000000e+00> : vector<256x3xf32>
    %10 = tpu.matmul %9, %8, %cst_9 {dimension_numbers = #tpu.dot_dimension_numbers<[1], [0], [0], [1], [0, 0, 1, 1], [], []>} : vector<256x4xf32>, vector<4x3xf32>, vector<256x3xf32> -> vector<256x3xf32>
    %c0_10 = arith.constant 0 : index
    %c0_11 = arith.constant 0 : index
    %c0_12 = arith.constant 0 : index
    %11 = vector.load %arg5[%c0_10, %c0_11, %c0_12] : memref<1x256x3xf32, #tpu.memory_space<vmem>>, vector<1x256x3xf32>
    %12 = vector.shape_cast %11 : vector<1x256x3xf32> to vector<256x3xf32>
    %13 = vector.shape_cast %10 : vector<256x3xf32> to vector<1x256x3xf32>
    tpu.vector_store %arg5[%c0_10, %c0_11, %c0_12], %13 {strides = array<i32>} : memref<1x256x3xf32, #tpu.memory_space<vmem>>, vector<1x256x3xf32>,
    return
  }
  func.func @transform_0(%arg0: i32) -> (i32, i32, i32) {
    %c0_i32 = arith.constant 0 : i32
    %c0_i32_0 = arith.constant 0 : i32
    %c0_i32_1 = arith.constant 0 : i32
    return %arg0, %c0_i32, %c0_i32_0 : i32, i32, i32
  }
  func.func @transform_1(%arg0: i32) -> (i32, i32) {
    %c0_i32 = arith.constant 0 : i32
    %c0_i32_0 = arith.constant 0 : i32
    %c0_i32_1 = arith.constant 0 : i32
    return %c0_i32, %c0_i32_0 : i32, i32
  }
  func.func @transform_2(%arg0: i32) -> (i32, i32) {
    %c0_i32 = arith.constant 0 : i32
    %c0_i32_0 = arith.constant 0 : i32
    %c0_i32_1 = arith.constant 0 : i32
    return %c0_i32, %c0_i32_0 : i32, i32
  }
  func.func @transform_3(%arg0: i32) -> (i32, i32) {
    %c0_i32 = arith.constant 0 : i32
    %c0_i32_0 = arith.constant 0 : i32
    %c0_i32_1 = arith.constant 0 : i32
    return %c0_i32, %c0_i32_0 : i32, i32
  }
  func.func @transform_4(%arg0: i32) -> (i32, i32, i32) {
    %c0_i32 = arith.constant 0 : i32
    %c0_i32_0 = arith.constant 0 : i32
    %c0_i32_1 = arith.constant 0 : i32
    return %arg0, %c0_i32, %c0_i32_0 : i32, i32, i32
  }
}

</mosaic_0001>

<bundles_post_ra>
// kernel: cc_alex_fcn4_forward.4
= control target key start
LH: loop header
LB: loop body
LE: loop exit
PB: predicated region body
PF: predicated region fallthrough
CT: control target
= control target key end

     0   :  { %8 = vsyncpa [#allocation4], 0  ;;  %s1260_s0 = inlined_call_operand.vmem [shape: bf16[128,27], index: 0, kind: input, shape index: {}]   ;;  %s1261_s1 = inlined_call_operand.hbm [shape: bf16[27,256], index: 1, kind: input, shape index: {}]   ;;  %s1262_s2 = inlined_call_operand.hbm [shape: f32[1,256], index: 2, kind: input, shape index: {}]   ;;  %s1263_s3 = inlined_call_operand.vmem [shape: f32[128,256], index: 3, kind: output, shape index: {}]  }
   0x1   :  { %10 = vsyncpa [#allocation4 + $0x1], 0 }
   0x2   :  { %11 = vsyncpa [#allocation6], 0 }
   0x3   :  { %13 = vsyncpa [#allocation6 + $0x1], 0  ;;  %s1076_s12 = smov 0   ;;  %s1078_s13 = smov 0  }
   0x4   :  { %s1080_s14 = smov 0   ;;  %s1082_s15 = smov 0  }
   0x5   :  { %s1084_s16 = smov 0   ;;  %s1086_s17 = smov 0  }
   0x6 LB: > { %s793_s18 = sadd.s32 4294967295, %s1050_s17   ;;  %s34_s19 = sadd.s32 1, %s1046_s16  ;;  %s1050_s17 = sphi %s1086_s17, %s19_s17   ;;  %s1046_s16 = sphi %s1084_s16, %s1272_s16   ;;  %s1042_s15 = sphi %s1082_s15, %s1271_s15   ;;  %s1038_s14 = sphi %s1080_s14, %s1270_s14   ;;  %s1034_s13 = sphi %s1078_s13, %s1269_s13   ;;  %s1030_s12 = sphi %s1076_s12, %s1268_s12  }
   0x7   : > { %p36_p0 = scmp.ge.s32.totalorder %s34_s19, 2  ;;  %s75_s20 = sadd.s32 1, %s1038_s14 }
   0x8   : > { %p82_p1 = scmp.ne.s32.totalorder %s1038_s14, %s1034_s13  ;;  %p83_p2 = scmp.eq.s32.totalorder %s1050_s17, 0 }
   0x9   : > { %s1274_s19 = smov (%p36_p0, %s34_s19), 0  ;;  %p88_p4 = scmp.ne.s32.totalorder %s1034_s13, %s1030_s12 }
   0xa   : > { %p1112_p3 = por %p83_p2, %p82_p1  ;;  %s71_s22 = ssub.s32 %s1046_s16, %s1274_s19 }
   0xb   : > { %p89_p5 = scmp.eq.s32.totalorder %s793_s18, 0  ;;  %p73_p6 = scmp.eq.s32.totalorder %s71_s22, 0 }
   0xc   : > { %p140_p7 = scmp.eq.s32.totalorder %s793_s18, 1  ;;  %p882_p10 = scmp.lt.s32.totalorder %s1050_s17, 2 }
   0xd   : > { %p1119_p8 = por %p89_p5, %p88_p4  ;;  %s178_s26 = sand.u32 1, %s1038_s14  }
   0xe   : > { %s1124_s24 = scalar_select %p73_p6, %s1038_s14, %s75_s20  }
   0xf   : > { %p1126_p9 = por %p140_p7, %p82_p1  ;;  %s799_s27 = sshll.u32 %s1046_s16, 2 }
  0x10   : > { %s798_s28 = sshll.u32 %s178_s26, 4  ;;  %s189_s4 = scalar_lea.hbm %s1261_s1, %s799_s27 }
  0x11   : > { %s190_s5 = sshll.u32 %s189_s4, 4  ;;  %s182_s6 = scalar_lea.vmem [#allocation3], %s798_s28  ;;  %s191_s5 = int_to_ptr.hbm [resolvable:$true] %s190_s5 }
  0x12   : > { %s192_s7 = sshll.u32 %s182_s6, 4  ;;  %p1138_p11 = pnand %p882_p10, %p1112_p3  ;;  %s193_s7 = int_to_ptr.vmem [resolvable:$true] %s192_s7 }
  0x13   : > { %p800_p12 = scmp.ge.s32.totalorder %s1050_s17, 1  ;;  %s179_s9 = scalar_lea.sflag [#allocation4], %s178_s26 }
  0x14   : > { %s1052_s10 = smov 128   ;;  %s1053_s11 = smov 64  }
  0x15   : > { %s1054_s12 = smov 4   ;;  %p217_p13 = scmp.lt.s32.totalorder %s1050_s17, 3 }
  0x16   : > { %878 = dma.hbm_to_vmem [thread:$0]  (!%p1138_p11), %s191_s5, 256, %s193_s7, %s179_s9, %s1052_s10, %s1053_s11, %s1054_s12  }
  0x17   : > { %s208_s22 = scalar_lea.hbm %s1262_s2, %s1046_s16  ;;  %p218_p0 = pnand %p800_p12, %p217_p13 }
  0x18   : > { %s210_s21 = sshll.u32 %s208_s22, 4  ;;  %s205_s27 = scalar_lea.vmem [#allocation5], %s178_s26  ;;  %s211_s21 = int_to_ptr.hbm [resolvable:$true] %s210_s21 }
  0x19   : > { %s212_s28 = sshll.u32 %s205_s27, 4  ;;  %s203_s29 = scalar_lea.sflag [#allocation6], %s178_s26  ;;  %s213_s28 = int_to_ptr.vmem [resolvable:$true] %s212_s28 }
  0x1a   : > { %881 = dma.hbm_to_vmem [thread:$0]  (!%p1138_p11), %s211_s21, 16, %s213_s28, %s203_s29  }
  0x1b   : > { %221 = sbr.rel (%p218_p0) target bundleno = 219 (0xdb), region = 32  ;;  %s1153_s30 = sand.u32 (!%p218_p0), 1, %s1034_s13  }
  0x1c   : > { %s801_s4 = sshll.u32 (!%p218_p0), %s1153_s30, 4  ;;  %s224_s5 = scalar_lea.sflag (!%p218_p0), [#allocation4], %s1153_s30 }
  0x1d   : > { %s227_s6 = scalar_lea.vmem (!%p218_p0), [#allocation3], %s801_s4 }
  0x20   : > { %1021 = dma.done.wait (%p1119_p8), %s224_s5, 256  }
  0x21   : > { %1023 = vsyncadd (%p1119_p8), %s224_s5, 4294967040  ;;  %s234_s26 = scalar_lea.sflag [#allocation6], %s1153_s30  ;;  %s236_s7 = scalar_lea.vmem [#allocation5], %s1153_s30 }
  0x22   : > { %1025 = dma.done.wait (%p1119_p8), %s234_s26, 16  }
  0x23   : > { %1027 = vsyncadd (%p1119_p8), %s234_s26, 4294967280  ;;  %vm415_vm0 = vcmask 1044480   ;;  %vm416_vm1 = vcmask 1045504   ;;  %v1055_v0 = vmov 65535   ;;  %v841_v2 = vld [vmem:[%s227_s6 + $0x8] sm:$0xf] }
  0x24   : > { %v417_v1 = vsel %vm415_vm0, 4294967295, %v1055_v0  ;;  %v864_v3 = vld [vmem:[%s227_s6 + $0x8] sm:$0x30]  ;;  %v863_v7 = vld [vmem:[%s227_s6] sm:$0xff]  ;;  %vm390_vm2 = vcmask 220160   ;;  %s802_s26 = sshll.u32 %s1153_s30, 7 }
  0x25   : > { %v418_v4 = vsel %vm416_vm1, %v417_v1, 0  ;;  %v842_v5 = vor.u32 %v864_v3, %v841_v2  ;;  %v855_v8 = vld [vmem:[%s1260_s0] sm:$0xff]  ;;  %v857_v9 = vld [vmem:[%s1260_s0 + $0x10] sm:$0xff]  ;;  %v856_v12 = vld [vmem:[%s1260_s0 + $0x8] sm:$0xff]  ;;  %s1202_s8 = scalar_lea.vmem [#allocation7], %s802_s26  ;;  %s852_s30 = sshll.u32 (%p1126_p9), %s1042_s15, 3 }
  0x26   : > { %v859_v10 = vld [vmem:[%s1260_s0 + $0x20] sm:$0xff]  ;;  %v861_v11 = vld [vmem:[%s1260_s0 + $0x30] sm:$0xff]  ;;  %v858_v13 = vld [vmem:[%s1260_s0 + $0x18] sm:$0xff]  ;;  %s585_s23 = scalar_lea.vmem (%p1126_p9), %s1263_s3, %s852_s30 }
  0x27   : > { %v420_v6 = vand.u32 %v842_v5, %v418_v4  ;;  %v860_v14 = vld [vmem:[%s1260_s0 + $0x28] sm:$0xff]  ;;  %v862_v15 = vld [vmem:[%s1260_s0 + $0x38] sm:$0xff]  ;;  %v935_v16 = vld [vmem:[%s236_s7] ss:$0 sm:$0xff] }
  0x29   : > { %428 = vmatpush.bf16.msra.mxu0 %v420_v6  ;;  %865 = vmatpush.bf16.msra.mxu1 %v420_v6 }
  0x2a   : > { %866 = vmatpush.bf16.msra.mxu2 %v420_v6  ;;  %867 = vmatpush.bf16.msra.mxu3 %v420_v6 }
  0x2d   : > { %429 = vmatpush.bf16.msra.mxu0 %v863_v7  ;;  %868 = vmatpush.bf16.msra.mxu1 %v863_v7 }
  0x2e   : > { %869 = vmatpush.bf16.msra.mxu2 %v863_v7  ;;  %870 = vmatpush.bf16.msra.mxu3 %v863_v7 }
  0x30   : > { %843 = vmatmul.msk.bf16.vlgmr.msra.gmra.mxu0 %vm390_vm2, %v855_v8  ;;  %845 = vmatmul.msk.bf16.vlgmr.msra.gmra.mxu1 %vm390_vm2, %v857_v9 }
  0x31   : > { %847 = vmatmul.msk.bf16.vlgmr.msra.gmra.mxu2 %vm390_vm2, %v859_v10  ;;  %849 = vmatmul.msk.bf16.vlgmr.msra.gmra.mxu3 %vm390_vm2, %v861_v11 }
  0x40   : > { %844 = vmatmul.msk.bf16.gmra.mxu0 %vm390_vm2, %v856_v12  ;;  %846 = vmatmul.msk.bf16.gmra.mxu1 %vm390_vm2, %v858_v13 }
  0x41   : > { %848 = vmatmul.msk.bf16.gmra.mxu2 %vm390_vm2, %v860_v14  ;;  %850 = vmatmul.msk.bf16.gmra.mxu3 %vm390_vm2, %v862_v15 }
  0xad   : > { %v431_v17 = vpop.f32.mrf.mxu0  ;;  %v441_v18 = vpop.f32.mrf.mxu1 }
  0xae   : > { %v526_v19 = vadd.f32 %v935_v16, %v431_v17  ;;  %v530_v20 = vadd.f32 %v935_v16, %v441_v18 }
  0xb0   : > { %v542_v21 = vmax.f32 %v526_v19, 0.0  ;;  %v546_v22 = vmax.f32 %v530_v20, 0.0 }
  0xb2   : > { %558 = vst [vmem:[%s1202_s8] sm:$0xff] %v542_v21 }
  0xb3   : > { %562 = vst [vmem:[%s1202_s8 + $0x20] sm:$0xff] %v546_v22 }
  0xb4   : > { %v451_v23 = vpop.f32.mrf.mxu2  ;;  %v461_v24 = vpop.f32.mrf.mxu3 }
  0xb5   : > { %v534_v25 = vadd.f32 %v935_v16, %v451_v23  ;;  %v538_v26 = vadd.f32 %v935_v16, %v461_v24  ;;  %v433_v27 = vpop.f32.mrf.mxu0  ;;  %v443_v28 = vpop.f32.mrf.mxu1 }
  0xb6   : > { %v527_v29 = vadd.f32 %v935_v16, %v433_v27  ;;  %v531_v30 = vadd.f32 %v935_v16, %v443_v28 }
  0xb7   : > { %v550_v31 = vmax.f32 %v534_v25, 0.0  ;;  %v554_v32 = vmax.f32 %v538_v26, 0.0 }
  0xb8   : > { %v543_v33 = vmax.f32 %v527_v29, 0.0  ;;  %v547_v34 = vmax.f32 %v531_v30, 0.0 }
  0xb9   : > { %566 = vst [vmem:[%s1202_s8 + $0x40] sm:$0xff] %v550_v31  ;;  %v644_v1 = vld [vmem:[%s1202_s8] sm:$0xff] (%p1126_p9) }
  0xba   : > { %570 = vst [vmem:[%s1202_s8 + $0x60] sm:$0xff] %v554_v32  ;;  %v652_v5 = vld [vmem:[%s1202_s8 + $0x20] sm:$0xff] (%p1126_p9) }
  0xbb   : > { %559 = vst [vmem:[%s1202_s8 + $0x8] sm:$0xff] %v543_v33 }
  0xbc   : > { %563 = vst [vmem:[%s1202_s8 + $0x28] sm:$0xff] %v547_v34  ;;  %v453_v35 = vpop.f32.mrf.mxu2  ;;  %v463_v36 = vpop.f32.mrf.mxu3 }
  0xbd   : > { %v535_v37 = vadd.f32 %v935_v16, %v453_v35  ;;  %v539_v38 = vadd.f32 %v935_v16, %v463_v36  ;;  %v436_v39 = vpop.f32.mrf.mxu0  ;;  %v446_v40 = vpop.f32.mrf.mxu1  ;;  %645 = vst [vmem:[%s585_s23] sm:$0xff] (%p1126_p9), %v644_v1 }
  0xbe   : > { %v528_v41 = vadd.f32 %v935_v16, %v436_v39  ;;  %v532_v42 = vadd.f32 %v935_v16, %v446_v40  ;;  %653 = vst [vmem:[%s585_s23 + $0x40] sm:$0xff] (%p1126_p9), %v652_v5 }
  0xbf   : > { %v551_v43 = vmax.f32 %v535_v37, 0.0  ;;  %v555_v44 = vmax.f32 %v539_v38, 0.0 }
  0xc0   : > { %v544_v45 = vmax.f32 %v528_v41, 0.0  ;;  %v548_v46 = vmax.f32 %v532_v42, 0.0  ;;  %v660_v9 = vld [vmem:[%s1202_s8 + $0x40] sm:$0xff] (%p1126_p9) }
  0xc1   : > { %567 = vst [vmem:[%s1202_s8 + $0x48] sm:$0xff] %v551_v43  ;;  %v668_v13 = vld [vmem:[%s1202_s8 + $0x60] sm:$0xff] (%p1126_p9) }
  0xc2   : > { %571 = vst [vmem:[%s1202_s8 + $0x68] sm:$0xff] %v555_v44  ;;  %v646_v2 = vld [vmem:[%s1202_s8 + $0x8] sm:$0xff] (%p1126_p9) }
  0xc3   : > { %560 = vst [vmem:[%s1202_s8 + $0x10] sm:$0xff] %v544_v45  ;;  %v654_v6 = vld [vmem:[%s1202_s8 + $0x28] sm:$0xff] (%p1126_p9) }
  0xc4   : > { %564 = vst [vmem:[%s1202_s8 + $0x30] sm:$0xff] %v548_v46  ;;  %v456_v47 = vpop.f32.mrf.mxu2  ;;  %v466_v48 = vpop.f32.mrf.mxu3 }
  0xc5   : > { %v536_v49 = vadd.f32 %v935_v16, %v456_v47  ;;  %v540_v50 = vadd.f32 %v935_v16, %v466_v48  ;;  %v438_v51 = vpop.f32.mrf.mxu0  ;;  %v448_v52 = vpop.f32.mrf.mxu1  ;;  %647 = vst [vmem:[%s585_s23 + $0x10] sm:$0xff] (%p1126_p9), %v646_v2 }
  0xc6   : > { %v529_v53 = vadd.f32 %v935_v16, %v438_v51  ;;  %v533_v54 = vadd.f32 %v935_v16, %v448_v52  ;;  %655 = vst [vmem:[%s585_s23 + $0x50] sm:$0xff] (%p1126_p9), %v654_v6 }
  0xc7   : > { %v552_v55 = vmax.f32 %v536_v49, 0.0  ;;  %v556_v56 = vmax.f32 %v540_v50, 0.0  ;;  %661 = vst [vmem:[%s585_s23 + $0x80] sm:$0xff] (%p1126_p9), %v660_v9 }
  0xc8   : > { %v545_v57 = vmax.f32 %v529_v53, 0.0  ;;  %v549_v58 = vmax.f32 %v533_v54, 0.0  ;;  %v662_v10 = vld [vmem:[%s1202_s8 + $0x48] sm:$0xff] (%p1126_p9)  ;;  %669 = vst [vmem:[%s585_s23 + $0xc0] sm:$0xff] (%p1126_p9), %v668_v13 }
  0xc9   : > { %568 = vst [vmem:[%s1202_s8 + $0x50] sm:$0xff] %v552_v55  ;;  %v670_v14 = vld [vmem:[%s1202_s8 + $0x68] sm:$0xff] (%p1126_p9) }
  0xca   : > { %572 = vst [vmem:[%s1202_s8 + $0x70] sm:$0xff] %v556_v56  ;;  %v648_v3 = vld [vmem:[%s1202_s8 + $0x10] sm:$0xff] (%p1126_p9) }
  0xcb   : > { %561 = vst [vmem:[%s1202_s8 + $0x18] sm:$0xff] %v545_v57  ;;  %v656_v7 = vld [vmem:[%s1202_s8 + $0x30] sm:$0xff] (%p1126_p9) }
  0xcc   : > { %565 = vst [vmem:[%s1202_s8 + $0x38] sm:$0xff] %v549_v58  ;;  %v458_v59 = vpop.f32.mrf.mxu2  ;;  %v468_v60 = vpop.f32.mrf.mxu3 }
  0xcd   : > { %v537_v61 = vadd.f32 %v935_v16, %v458_v59  ;;  %v541_v62 = vadd.f32 %v935_v16, %v468_v60  ;;  %649 = vst [vmem:[%s585_s23 + $0x20] sm:$0xff] (%p1126_p9), %v648_v3 }
  0xce   : > { %580 = sbr.rel (!%p1126_p9) target bundleno = 219 (0xdb), region = 52  ;;  %657 = vst [vmem:[%s585_s23 + $0x60] sm:$0xff] (%p1126_p9), %v656_v7 }
  0xcf   : > { %v553_v63 = vmax.f32 %v537_v61, 0.0  ;;  %v557_v0 = vmax.f32 %v541_v62, 0.0  ;;  %663 = vst [vmem:[%s585_s23 + $0x90] sm:$0xff] (%p1126_p9), %v662_v10 }
  0xd0   : > { %v664_v11 = vld [vmem:[%s1202_s8 + $0x50] sm:$0xff] (%p1126_p9)  ;;  %671 = vst [vmem:[%s585_s23 + $0xd0] sm:$0xff] (%p1126_p9), %v670_v14 }
  0xd1   : > { %569 = vst [vmem:[%s1202_s8 + $0x58] sm:$0xff] %v553_v63  ;;  %v672_v15 = vld [vmem:[%s1202_s8 + $0x70] sm:$0xff] (%p1126_p9) }
  0xd2   : > { %573 = vst [vmem:[%s1202_s8 + $0x78] sm:$0xff] %v557_v0  ;;  %v650_v4 = vld [vmem:[%s1202_s8 + $0x18] sm:$0xff] (%p1126_p9) }
  0xd3   : > { %651 = vst [vmem:[%s585_s23 + $0x30] sm:$0xff] %v650_v4  ;;  %v658_v8 = vld [vmem:[%s1202_s8 + $0x38] sm:$0xff] }
  0xd4   : > { %659 = vst [vmem:[%s585_s23 + $0x70] sm:$0xff] %v658_v8 }
  0xd5   : > { %665 = vst [vmem:[%s585_s23 + $0xa0] sm:$0xff] %v664_v11 }
  0xd6   : > { %673 = vst [vmem:[%s585_s23 + $0xe0] sm:$0xff] %v672_v15 }
  0xd8   : > { %v666_v12 = vld [vmem:[%s1202_s8 + $0x58] sm:$0xff] }
  0xd9   : > { %667 = vst [vmem:[%s585_s23 + $0xb0] sm:$0xff] %v666_v12  ;;  %v674_v16 = vld [vmem:[%s1202_s8 + $0x78] sm:$0xff] }
  0xda   : > { %675 = vst [vmem:[%s585_s23 + $0xf0] sm:$0xff] %v674_v16 }
  0xdb PF: > { %s19_s17 = sadd.s32 1, %s1050_s17   ;;  %s1268_s12 = smov %s1034_s13 }
  0xdc   : > { %p16_p1 = scmp.ge.s32.totalorder %s19_s17, 4   ;;  %s1269_s13 = smov %s1038_s14 }
  0xdd   : > { %s1270_s14 = smov %s1124_s24  ;;  %s1271_s15 = smov %s1046_s16 }
  0xde   : > { %s1272_s16 = smov %s1274_s19  ;;  %18 = sbr.rel (!%p16_p1) target bundleno = 6 (0x6), region = 134 }
  0xe3   :  { %691 = vsyncpa [#allocation4], 1 }
  0xe4   :  { %693 = vsyncpa [#allocation4 + $0x1], 1 }
  0xe5   :  { %694 = vsyncpa [#allocation6], 1 }
  0xe6   :  { %696 = vsyncpa [#allocation6 + $0x1], 1 }

// kernel: cc_alex_fcn4_forward.5
= control target key start
LH: loop header
LB: loop body
LE: loop exit
PB: predicated region body
PF: predicated region fallthrough
CT: control target
= control target key end

     0   :  { %s1712_s12 = smov 0   ;;  %s1714_s13 = smov 0   ;;  %s1995_s0 = inlined_call_operand.vmem [shape: bf16[256,9216], index: 0, kind: input, shape index: {}]   ;;  %s1996_s1 = inlined_call_operand.vmem [shape: bf16[9216,128], index: 1, kind: input, shape index: {}]   ;;  %s1997_s2 = inlined_call_operand.vmem [shape: f32[1,128], index: 2, kind: input, shape index: {}]   ;;  %s1998_s3 = inlined_call_operand.vmem [shape: f32[256,128], index: 3, kind: output, shape index: {}]  }
   0x1   :  { %s1716_s14 = smov 0   ;;  %s1718_s15 = smov 0  }
   0x2   :  { %s1720_s16 = smov 0   ;;  %s1722_s17 = smov 0  }
   0x3   :  { %s1724_s18 = smov 0  }
   0x4 LB: > { %s25_s19 = sadd.s32 1, %s1681_s16  ;;  %s32_s20 = sadd.s32 1, %s1685_s17  ;;  %s1689_s18 = sphi %s1724_s18, %s13_s18   ;;  %s1685_s17 = sphi %s1722_s17, %s2004_s17   ;;  %s1681_s16 = sphi %s1720_s16, %s2003_s16   ;;  %s1677_s15 = sphi %s1718_s15, %s2002_s15   ;;  %s1673_s14 = sphi %s1716_s14, %s2001_s14   ;;  %s1669_s13 = sphi %s1714_s13, %s2000_s13   ;;  %s1665_s12 = sphi %s1712_s12, %s1999_s12  }
   0x5   : > { %p26_p0 = scmp.ge.s32.totalorder %s25_s19, 18  ;;  %p48_p1 = scmp.ne.s32.totalorder %s1669_s13, %s1665_s12 }
   0x6   : > { %p49_p2 = scmp.eq.s32.totalorder %s1689_s18, 0  ;;  %s41_s24 = sadd.s32 1, %s1669_s13 }
   0x7   : > { %s2006_s19 = smov (%p26_p0, %s25_s19), 0  ;;  %s2008_s20 = smov (!%p26_p0, %s32_s20), %s1685_s17 }
   0x8   : > { %p50_p3 = por %p49_p2, %p48_p1  ;;  %p34_p4 = scmp.ge.s32.totalorder %s2008_s20, 2 }
   0x9   : > { %s37_s21 = ssub.s32 %s1681_s16, %s2006_s19  ;;  %p1240_p6 = scmp.ge.s32.totalorder %s1689_s18, 36 }
   0xa   : > { %s2010_s20 = smov (%p34_p4, %s2008_s20), 0 }
   0xb   : > { %s36_s22 = ssub.s32 %s1685_s17, %s2010_s20  ;;  %162 = sbr.rel (%p1240_p6) target bundleno = 56 (0x38), region = 20 }
   0xc   : > { %s38_s23 = sor.u32 %s37_s21, %s36_s22 }
   0xd   : > { %p39_p5 = scmp.eq.s32.totalorder %s38_s23, 0 }
   0xf   : > { %s1763_s25 = scalar_select %p39_p5, %s1669_s13, %s41_s24  }
  0x10   : > { %165 = sbr.rel (!%p50_p3) target bundleno = 56 (0x38), region = 24  ;;  %s167_s26 = sand.u32 (%p50_p3), 1, %s1669_s13  }
  0x11   : > { %s1243_s27 = sshll.u32 (%p50_p3), %s1681_s16, 2  ;;  %s1241_s28 = sshll.u32 (%p50_p3), %s167_s26, 8 }
  0x12   : > { %s1576_s29 = smul.u32 (%p50_p3), 1152, %s1685_s17  ;;  %s1777_s8 = scalar_lea.vmem (%p50_p3), [#allocation3], %s1241_s28 }
  0x14   : > { %s173_s30 = sadd.s32 (%p50_p3), %s1576_s29, %s1243_s27 }
  0x15   : > { %s1245_s4 = sshll.u32 %s173_s30, 2 }
  0x16   : > { %s1772_s7 = scalar_lea.vmem %s1995_s0, %s1245_s4 }
  0x17   : > { %v188_v0 = vld [vmem:[%s1772_s7] sm:$0xff]  ;;  %v190_v1 = vld [vmem:[%s1772_s7 + $0x8] sm:$0xff] }
  0x18   : > { %v192_v2 = vld [vmem:[%s1772_s7 + $0x120] sm:$0xff]  ;;  %189 = vst [vmem:[%s1777_s8] sm:$0xff] %v188_v0  ;;  %v194_v3 = vld [vmem:[%s1772_s7 + $0x128] sm:$0xff] }
  0x19   : > { %191 = vst [vmem:[%s1777_s8 + $0x8] sm:$0xff] %v190_v1  ;;  %v196_v4 = vld [vmem:[%s1772_s7 + $0x240] sm:$0xff]  ;;  %v198_v5 = vld [vmem:[%s1772_s7 + $0x248] sm:$0xff] }
  0x1a   : > { %193 = vst [vmem:[%s1777_s8 + $0x10] sm:$0xff] %v192_v2  ;;  %v200_v6 = vld [vmem:[%s1772_s7 + $0x360] sm:$0xff]  ;;  %v202_v7 = vld [vmem:[%s1772_s7 + $0x368] sm:$0xff] }
  0x1b   : > { %195 = vst [vmem:[%s1777_s8 + $0x18] sm:$0xff] %v194_v3  ;;  %v204_v8 = vld [vmem:[%s1772_s7 + $0x480] sm:$0xff]  ;;  %v206_v9 = vld [vmem:[%s1772_s7 + $0x488] sm:$0xff] }
  0x1c   : > { %197 = vst [vmem:[%s1777_s8 + $0x20] sm:$0xff] %v196_v4  ;;  %v208_v10 = vld [vmem:[%s1772_s7 + $0x5a0] sm:$0xff]  ;;  %v210_v11 = vld [vmem:[%s1772_s7 + $0x5a8] sm:$0xff] }
  0x1d   : > { %199 = vst [vmem:[%s1777_s8 + $0x28] sm:$0xff] %v198_v5  ;;  %v212_v12 = vld [vmem:[%s1772_s7 + $0x6c0] sm:$0xff]  ;;  %v214_v13 = vld [vmem:[%s1772_s7 + $0x6c8] sm:$0xff] }
  0x1e   : > { %201 = vst [vmem:[%s1777_s8 + $0x30] sm:$0xff] %v200_v6  ;;  %v216_v14 = vld [vmem:[%s1772_s7 + $0x7e0] sm:$0xff]  ;;  %v218_v15 = vld [vmem:[%s1772_s7 + $0x7e8] sm:$0xff] }
  0x1f   : > { %203 = vst [vmem:[%s1777_s8 + $0x38] sm:$0xff] %v202_v7  ;;  %v220_v16 = vld [vmem:[%s1772_s7 + $0x900] sm:$0xff]  ;;  %v222_v17 = vld [vmem:[%s1772_s7 + $0x908] sm:$0xff] }
  0x20   : > { %205 = vst [vmem:[%s1777_s8 + $0x40] sm:$0xff] %v204_v8  ;;  %v224_v18 = vld [vmem:[%s1772_s7 + $0xa20] sm:$0xff]  ;;  %v226_v19 = vld [vmem:[%s1772_s7 + $0xa28] sm:$0xff] }
  0x21   : > { %207 = vst [vmem:[%s1777_s8 + $0x48] sm:$0xff] %v206_v9  ;;  %v228_v20 = vld [vmem:[%s1772_s7 + $0xb40] sm:$0xff]  ;;  %v230_v21 = vld [vmem:[%s1772_s7 + $0xb48] sm:$0xff] }
  0x22   : > { %209 = vst [vmem:[%s1777_s8 + $0x50] sm:$0xff] %v208_v10  ;;  %v232_v22 = vld [vmem:[%s1772_s7 + $0xc60] sm:$0xff]  ;;  %v234_v23 = vld [vmem:[%s1772_s7 + $0xc68] sm:$0xff] }
  0x23   : > { %211 = vst [vmem:[%s1777_s8 + $0x58] sm:$0xff] %v210_v11  ;;  %v236_v24 = vld [vmem:[%s1772_s7 + $0xd80] sm:$0xff]  ;;  %v238_v25 = vld [vmem:[%s1772_s7 + $0xd88] sm:$0xff] }
  0x24   : > { %213 = vst [vmem:[%s1777_s8 + $0x60] sm:$0xff] %v212_v12  ;;  %v240_v26 = vld [vmem:[%s1772_s7 + $0xea0] sm:$0xff]  ;;  %v242_v27 = vld [vmem:[%s1772_s7 + $0xea8] sm:$0xff] }
  0x25   : > { %215 = vst [vmem:[%s1777_s8 + $0x68] sm:$0xff] %v214_v13  ;;  %v244_v28 = vld [vmem:[%s1772_s7 + $0xfc0] sm:$0xff]  ;;  %v246_v29 = vld [vmem:[%s1772_s7 + $0xfc8] sm:$0xff] }
  0x26   : > { %217 = vst [vmem:[%s1777_s8 + $0x70] sm:$0xff] %v216_v14  ;;  %v248_v30 = vld [vmem:[%s1772_s7 + $0x10e0] sm:$0xff]  ;;  %v250_v31 = vld [vmem:[%s1772_s7 + $0x10e8] sm:$0xff] }
  0x27   : > { %219 = vst [vmem:[%s1777_s8 + $0x78] sm:$0xff] %v218_v15 }
  0x28   : > { %221 = vst [vmem:[%s1777_s8 + $0x80] sm:$0xff] %v220_v16 }
  0x29   : > { %223 = vst [vmem:[%s1777_s8 + $0x88] sm:$0xff] %v222_v17 }
  0x2a   : > { %225 = vst [vmem:[%s1777_s8 + $0x90] sm:$0xff] %v224_v18 }
  0x2b   : > { %227 = vst [vmem:[%s1777_s8 + $0x98] sm:$0xff] %v226_v19 }
  0x2c   : > { %229 = vst [vmem:[%s1777_s8 + $0xa0] sm:$0xff] %v228_v20 }
  0x2d   : > { %231 = vst [vmem:[%s1777_s8 + $0xa8] sm:$0xff] %v230_v21 }
  0x2e   : > { %233 = vst [vmem:[%s1777_s8 + $0xb0] sm:$0xff] %v232_v22 }
  0x2f   : > { %235 = vst [vmem:[%s1777_s8 + $0xb8] sm:$0xff] %v234_v23 }
  0x30   : > { %237 = vst [vmem:[%s1777_s8 + $0xc0] sm:$0xff] %v236_v24 }
  0x31   : > { %239 = vst [vmem:[%s1777_s8 + $0xc8] sm:$0xff] %v238_v25 }
  0x32   : > { %241 = vst [vmem:[%s1777_s8 + $0xd0] sm:$0xff] %v240_v26 }
  0x33   : > { %243 = vst [vmem:[%s1777_s8 + $0xd8] sm:$0xff] %v242_v27 }
  0x34   : > { %245 = vst [vmem:[%s1777_s8 + $0xe0] sm:$0xff] %v244_v28 }
  0x35   : > { %247 = vst [vmem:[%s1777_s8 + $0xe8] sm:$0xff] %v246_v29 }
  0x36   : > { %249 = vst [vmem:[%s1777_s8 + $0xf0] sm:$0xff] %v248_v30 }
  0x37   : > { %251 = vst [vmem:[%s1777_s8 + $0xf8] sm:$0xff] %v250_v31 }
  0x38 PF: > { %p1246_p7 = scmp.ge.s32.totalorder %s1689_s18, 1  ;;  %p268_p8 = scmp.lt.s32.totalorder %s1689_s18, 37 }
  0x3a   : > { %p269_p9 = pnand %p1246_p7, %p268_p8 }
  0x3b   : > { %s275_s9 = sand.u32 (!%p269_p9), 1, %s1665_s12   ;;  %s1248_s10 = sshll.u32 (!%p269_p9), %s1673_s14, 6 }
  0x3c   : > { %272 = sbr.rel (%p269_p9) target bundleno = 404 (0x194), region = 51  ;;  %s1247_s11 = sshll.u32 (!%p269_p9), %s275_s9, 8 }
  0x3d   : > { %p315_p10 = scmp.lt.s32.totalorder (!%p269_p9), %s1248_s10, 1151  ;;  %s1250_s21 = sshll.u32 (!%p269_p9), %s1677_s15, 4 }
  0x3e   : > { %p327_p11 = scmp.lt.s32.totalorder (!%p269_p9), %s1250_s21, 31  ;;  %s1855_s12 = scalar_lea.vmem (!%p269_p9), [#allocation3], %s1247_s11 }
  0x3f   : > { %p1252_p12 = scmp.ne.s32.totalorder (!%p269_p9), %s1673_s14, 0 }
  0x41   : > { %s2012_s10 = smov (!%p315_p10, %s1248_s10), 1151  ;;  %s2014_s21 = smov (!%p327_p11, %s1250_s21), 31 }
  0x42   : > { %s1249_s22 = sshll.u32 %s2012_s10, 2  ;;  %s1251_s27 = sshll.u32 %s2014_s21, 3 }
  0x43   : > { %s1848_s26 = scalar_lea.vmem %s1996_s1, %s1249_s22  ;;  %s1853_s30 = scalar_lea.vmem %s1998_s3, %s1251_s27 }
  0x44   : > { %338 = sbr.rel (%p1252_p12) target bundleno = 90 (0x5a), region = 59 }
  0x49   : > { %v1691_v32 = vmov 0.0  }
  0x4a   : > { %339 = vst [vmem:[#allocation2 + $0x30] sm:$0xff] %v1691_v32 }
  0x4b   : > { %340 = vst [vmem:[#allocation2] sm:$0xff] %v1691_v32 }
  0x4c   : > { %341 = vst [vmem:[#allocation2 + $0x58] sm:$0xff] %v1691_v32 }
  0x4d   : > { %342 = vst [vmem:[#allocation2 + $0x18] sm:$0xff] %v1691_v32 }
  0x4e   : > { %343 = vst [vmem:[#allocation2 + $0x50] sm:$0xff] %v1691_v32 }
  0x4f   : > { %344 = vst [vmem:[#allocation2 + $0x68] sm:$0xff] %v1691_v32 }
  0x50   : > { %345 = vst [vmem:[#allocation2 + $0x8] sm:$0xff] %v1691_v32 }
  0x51   : > { %346 = vst [vmem:[#allocation2 + $0x48] sm:$0xff] %v1691_v32 }
  0x52   : > { %347 = vst [vmem:[#allocation2 + $0x40] sm:$0xff] %v1691_v32 }
  0x53   : > { %348 = vst [vmem:[#allocation2 + $0x20] sm:$0xff] %v1691_v32 }
  0x54   : > { %349 = vst [vmem:[#allocation2 + $0x10] sm:$0xff] %v1691_v32 }
  0x55   : > { %350 = vst [vmem:[#allocation2 + $0x38] sm:$0xff] %v1691_v32 }
  0x56   : > { %351 = vst [vmem:[#allocation2 + $0x60] sm:$0xff] %v1691_v32 }
  0x57   : > { %352 = vst [vmem:[#allocation2 + $0x70] sm:$0xff] %v1691_v32 }
  0x58   : > { %353 = vst [vmem:[#allocation2 + $0x78] sm:$0xff] %v1691_v32 }
  0x59   : > { %354 = vst [vmem:[#allocation2 + $0x28] sm:$0xff] %v1691_v32 }
  0x5a PF: > { %v1551_v33 = vld [vmem:[%s1848_s26 + $0x38] sm:$0xff]  ;;  %v1550_v37 = vld [vmem:[%s1848_s26 + $0x30] sm:$0xff]  ;;  %v1549_v41 = vld [vmem:[%s1848_s26 + $0x28] sm:$0xff]  ;;  %p1509_p13 = scmp.ne.s32.totalorder %s1673_s14, 17 }
  0x5b   : > { %v1559_v34 = vld [vmem:[%s1848_s26 + $0x78] sm:$0xff]  ;;  %819 = vmatpush.bf16.msra.mxu0 %v1551_v33  ;;  %v1558_v38 = vld [vmem:[%s1848_s26 + $0x70] sm:$0xff]  ;;  %v1557_v42 = vld [vmem:[%s1848_s26 + $0x68] sm:$0xff] }
  0x5c   : > { %v1567_v35 = vld [vmem:[%s1848_s26 + $0xb8] sm:$0xff]  ;;  %868 = vmatpush.bf16.msra.mxu1 %v1559_v34  ;;  %v1566_v39 = vld [vmem:[%s1848_s26 + $0xb0] sm:$0xff]  ;;  %v1565_v43 = vld [vmem:[%s1848_s26 + $0xa8] sm:$0xff] }
  0x5d   : > { %v1575_v36 = vld [vmem:[%s1848_s26 + $0xf8] sm:$0xff]  ;;  %917 = vmatpush.bf16.msra.mxu2 %v1567_v35  ;;  %v1574_v40 = vld [vmem:[%s1848_s26 + $0xf0] sm:$0xff]  ;;  %v1573_v44 = vld [vmem:[%s1848_s26 + $0xe8] sm:$0xff] }
  0x5e   : > { %966 = vmatpush.bf16.msra.mxu3 %v1575_v36  ;;  %v1548_v45 = vld [vmem:[%s1848_s26 + $0x20] sm:$0xff]  ;;  %v1547_v49 = vld [vmem:[%s1848_s26 + $0x18] sm:$0xff]  ;;  %v1546_v53 = vld [vmem:[%s1848_s26 + $0x10] sm:$0xff] }
  0x5f   : > { %820 = vmatpush.bf16.msra.mxu0 %v1550_v37  ;;  %v1556_v46 = vld [vmem:[%s1848_s26 + $0x60] sm:$0xff]  ;;  %v1555_v50 = vld [vmem:[%s1848_s26 + $0x58] sm:$0xff]  ;;  %v1554_v54 = vld [vmem:[%s1848_s26 + $0x50] sm:$0xff] }
  0x60   : > { %869 = vmatpush.bf16.msra.mxu1 %v1558_v38  ;;  %v1564_v47 = vld [vmem:[%s1848_s26 + $0xa0] sm:$0xff]  ;;  %v1563_v51 = vld [vmem:[%s1848_s26 + $0x98] sm:$0xff]  ;;  %v1562_v55 = vld [vmem:[%s1848_s26 + $0x90] sm:$0xff] }
  0x61   : > { %918 = vmatpush.bf16.msra.mxu2 %v1566_v39  ;;  %v1572_v48 = vld [vmem:[%s1848_s26 + $0xe0] sm:$0xff]  ;;  %v1571_v52 = vld [vmem:[%s1848_s26 + $0xd8] sm:$0xff]  ;;  %v1570_v56 = vld [vmem:[%s1848_s26 + $0xd0] sm:$0xff] }
  0x62   : > { %967 = vmatpush.bf16.msra.mxu3 %v1574_v40  ;;  %v1545_v57 = vld [vmem:[%s1848_s26 + $0x8] sm:$0xff]  ;;  %v1544_v61 = vld [vmem:[%s1848_s26] sm:$0xff]  ;;  %v1514_v2 = vld [vmem:[%s1855_s12 + $0xc] sm:$0xf0] }
  0x63   : > { %821 = vmatpush.bf16.msra.mxu0 %v1549_v41  ;;  %v1553_v58 = vld [vmem:[%s1848_s26 + $0x48] sm:$0xff]  ;;  %v1552_v62 = vld [vmem:[%s1848_s26 + $0x40] sm:$0xff]  ;;  %v1257_v4 = vld [vmem:[%s1855_s12 + $0x10] sm:$0xf0] }
  0x64   : > { %870 = vmatpush.bf16.msra.mxu1 %v1557_v42  ;;  %v1561_v59 = vld [vmem:[%s1848_s26 + $0x88] sm:$0xff]  ;;  %v1560_v63 = vld [vmem:[%s1848_s26 + $0x80] sm:$0xff]  ;;  %v1515_v6 = vld [vmem:[%s1855_s12 + $0x14] sm:$0xf0] }
  0x65   : > { %919 = vmatpush.bf16.msra.mxu2 %v1565_v43  ;;  %v1569_v60 = vld [vmem:[%s1848_s26 + $0xc8] sm:$0xff]  ;;  %v1568_v0 = vld [vmem:[%s1848_s26 + $0xc0] sm:$0xff]  ;;  %v1265_v8 = vld [vmem:[%s1855_s12 + $0x18] sm:$0xf0] }
  0x66   : > { %968 = vmatpush.bf16.msra.mxu3 %v1573_v44  ;;  %v1255_v1 = vld [vmem:[%s1855_s12] sm:$0xf]  ;;  %v1512_v3 = vld [vmem:[%s1855_s12 + $0x4] sm:$0xf]  ;;  %v1263_v5 = vld [vmem:[%s1855_s12 + $0x8] sm:$0xf] }
  0x67   : > { %822 = vmatpush.bf16.msra.mxu0 %v1548_v45  ;;  %v1513_v7 = vld [vmem:[%s1855_s12 + $0xc] sm:$0xf]  ;;  %v1256_v9 = vor.u32 %v1514_v2, %v1255_v1  ;;  %v1260_v10 = vor.u32 %v1512_v3, %v1257_v4  ;;  %v1264_v11 = vor.u32 %v1515_v6, %v1263_v5  ;;  %v1271_v13 = vld [vmem:[%s1855_s12 + $0x20] sm:$0xf]  ;;  %v1518_v14 = vld [vmem:[%s1855_s12 + $0x2c] sm:$0xf0] }
  0x68   : > { %871 = vmatpush.bf16.msra.mxu1 %v1556_v46  ;;  %v1268_v12 = vor.u32 %v1513_v7, %v1265_v8  ;;  %v1516_v15 = vld [vmem:[%s1855_s12 + $0x24] sm:$0xf]  ;;  %v1273_v16 = vld [vmem:[%s1855_s12 + $0x30] sm:$0xf0]  ;;  %v1279_v17 = vld [vmem:[%s1855_s12 + $0x28] sm:$0xf]  ;;  %v1272_v21 = vor.u32 %v1518_v14, %v1271_v13 }
  0x69   : > { %920 = vmatpush.bf16.msra.mxu2 %v1564_v47  ;;  %v1519_v18 = vld [vmem:[%s1855_s12 + $0x34] sm:$0xf0]  ;;  %v1517_v19 = vld [vmem:[%s1855_s12 + $0x2c] sm:$0xf]  ;;  %v1281_v20 = vld [vmem:[%s1855_s12 + $0x38] sm:$0xf0]  ;;  %v1276_v22 = vor.u32 %v1516_v15, %v1273_v16 }
  0x6a   : > { %969 = vmatpush.bf16.msra.mxu3 %v1572_v48  ;;  %v1280_v23 = vor.u32 %v1519_v18, %v1279_v17  ;;  %v1284_v24 = vor.u32 %v1517_v19, %v1281_v20  ;;  %v1287_v25 = vld [vmem:[%s1855_s12 + $0x40] sm:$0xf]  ;;  %v1522_v26 = vld [vmem:[%s1855_s12 + $0x4c] sm:$0xf0]  ;;  %v1520_v27 = vld [vmem:[%s1855_s12 + $0x44] sm:$0xf] }
  0x6b   : > { %823 = vmatpush.bf16.msra.mxu0 %v1547_v49  ;;  %v1289_v28 = vld [vmem:[%s1855_s12 + $0x50] sm:$0xf0]  ;;  %v1295_v29 = vld [vmem:[%s1855_s12 + $0x48] sm:$0xf]  ;;  %v1523_v30 = vld [vmem:[%s1855_s12 + $0x54] sm:$0xf0]  ;;  %v1288_v33 = vor.u32 %v1522_v26, %v1287_v25 }
  0x6c   : > { %872 = vmatpush.bf16.msra.mxu1 %v1555_v50  ;;  %v1521_v31 = vld [vmem:[%s1855_s12 + $0x4c] sm:$0xf]  ;;  %v1297_v32 = vld [vmem:[%s1855_s12 + $0x58] sm:$0xf0]  ;;  %v1292_v34 = vor.u32 %v1520_v27, %v1289_v28  ;;  %v1296_v35 = vor.u32 %v1523_v30, %v1295_v29  ;;  %v1303_v37 = vld [vmem:[%s1855_s12 + $0x60] sm:$0xf] }
  0x6d   : > { %921 = vmatpush.bf16.msra.mxu2 %v1563_v51  ;;  %v1300_v36 = vor.u32 %v1521_v31, %v1297_v32  ;;  %v1526_v38 = vld [vmem:[%s1855_s12 + $0x6c] sm:$0xf0]  ;;  %v1524_v39 = vld [vmem:[%s1855_s12 + $0x64] sm:$0xf]  ;;  %v1305_v40 = vld [vmem:[%s1855_s12 + $0x70] sm:$0xf0] }
  0x6e   : > { %970 = vmatpush.bf16.msra.mxu3 %v1571_v52  ;;  %v1311_v41 = vld [vmem:[%s1855_s12 + $0x68] sm:$0xf]  ;;  %v1527_v42 = vld [vmem:[%s1855_s12 + $0x74] sm:$0xf0]  ;;  %v1525_v43 = vld [vmem:[%s1855_s12 + $0x6c] sm:$0xf]  ;;  %v1304_v45 = vor.u32 %v1526_v38, %v1303_v37  ;;  %v1308_v46 = vor.u32 %v1524_v39, %v1305_v40 }
  0x6f   : > { %824 = vmatpush.bf16.msra.mxu0 %v1546_v53  ;;  %v1313_v44 = vld [vmem:[%s1855_s12 + $0x78] sm:$0xf0]  ;;  %v1312_v47 = vor.u32 %v1527_v42, %v1311_v41  ;;  %v1319_v49 = vld [vmem:[%s1855_s12 + $0x80] sm:$0xf]  ;;  %v1530_v50 = vld [vmem:[%s1855_s12 + $0x8c] sm:$0xf0] }
  0x70   : > { %873 = vmatpush.bf16.msra.mxu1 %v1554_v54  ;;  %v1316_v48 = vor.u32 %v1525_v43, %v1313_v44  ;;  %v1528_v51 = vld [vmem:[%s1855_s12 + $0x84] sm:$0xf]  ;;  %v1321_v52 = vld [vmem:[%s1855_s12 + $0x90] sm:$0xf0]  ;;  %v1327_v53 = vld [vmem:[%s1855_s12 + $0x88] sm:$0xf] }
  0x71   : > { %922 = vmatpush.bf16.msra.mxu2 %v1562_v55  ;;  %v1531_v54 = vld [vmem:[%s1855_s12 + $0x94] sm:$0xf0]  ;;  %v1529_v55 = vld [vmem:[%s1855_s12 + $0x8c] sm:$0xf]  ;;  %v1343_v1 = vld [vmem:[%s1855_s12 + $0xa8] sm:$0xf] }
  0x72   : > { %971 = vmatpush.bf16.msra.mxu3 %v1570_v56  ;;  %v1329_v56 = vld [vmem:[%s1855_s12 + $0x98] sm:$0xf0]  ;;  %v1535_v2 = vld [vmem:[%s1855_s12 + $0xb4] sm:$0xf0]  ;;  %v1533_v3 = vld [vmem:[%s1855_s12 + $0xac] sm:$0xf] }
  0x73   : > { %825 = vmatpush.bf16.msra.mxu0 %v1545_v57  ;;  %v1320_v57 = vor.u32 %v1530_v50, %v1319_v49  ;;  %v1345_v4 = vld [vmem:[%s1855_s12 + $0xb8] sm:$0xf0]  ;;  %v1344_v7 = vor.u32 %v1535_v2, %v1343_v1  ;;  %v1359_v13 = vld [vmem:[%s1855_s12 + $0xc8] sm:$0xf]  ;;  %v1539_v14 = vld [vmem:[%s1855_s12 + $0xd4] sm:$0xf0] }
  0x74   : > { %874 = vmatpush.bf16.msra.mxu1 %v1553_v58  ;;  %v1324_v58 = vor.u32 %v1528_v51, %v1321_v52  ;;  %v1348_v8 = vor.u32 %v1533_v3, %v1345_v4  ;;  %v1537_v15 = vld [vmem:[%s1855_s12 + $0xcc] sm:$0xf]  ;;  %v1361_v16 = vld [vmem:[%s1855_s12 + $0xd8] sm:$0xf0]  ;;  %v1360_v19 = vor.u32 %v1539_v14, %v1359_v13  ;;  %v1375_v25 = vld [vmem:[%s1855_s12 + $0xe8] sm:$0xf] }
  0x75   : > { %923 = vmatpush.bf16.msra.mxu2 %v1561_v59  ;;  %v1328_v59 = vor.u32 %v1531_v54, %v1327_v53  ;;  %v1364_v20 = vor.u32 %v1537_v15, %v1361_v16  ;;  %v1543_v26 = vld [vmem:[%s1855_s12 + $0xf4] sm:$0xf0]  ;;  %v1541_v27 = vld [vmem:[%s1855_s12 + $0xec] sm:$0xf]  ;;  %v1377_v28 = vld [vmem:[%s1855_s12 + $0xf8] sm:$0xf0] }
  0x76   : > { %972 = vmatpush.bf16.msra.mxu3 %v1569_v60  ;;  %v1332_v60 = vor.u32 %v1529_v55, %v1329_v56  ;;  %v1376_v31 = vor.u32 %v1543_v26, %v1375_v25  ;;  %v1380_v32 = vor.u32 %v1541_v27, %v1377_v28  ;;  %v355_v41 = vld [vmem:[#allocation2 + $0x30] sm:$0xff]  ;;  %v356_v50 = vld [vmem:[#allocation2] sm:$0xff]  ;;  %v358_v4 = vld [vmem:[#allocation2 + $0x18] sm:$0xff] }
  0x77   : > { %826 = vmatpush.bf16.msra.mxu0 %v1544_v61  ;;  %v1335_v61 = vld [vmem:[%s1855_s12 + $0xa0] sm:$0xf]  ;;  %v359_v13 = vld [vmem:[#allocation2 + $0x50] sm:$0xff] }
  0x78   : > { %875 = vmatpush.bf16.msra.mxu1 %v1552_v62  ;;  %v1534_v62 = vld [vmem:[%s1855_s12 + $0xac] sm:$0xf0] }
  0x79   : > { %924 = vmatpush.bf16.msra.mxu2 %v1560_v63  ;;  %v1532_v63 = vld [vmem:[%s1855_s12 + $0xa4] sm:$0xf]  ;;  %v1336_v5 = vor.u32 %v1534_v62, %v1335_v61 }
  0x7a   : > { %973 = vmatpush.bf16.msra.mxu3 %v1568_v0  ;;  %827 = vmatmul.bf16.vlgmr.msra.gmra.mxu0 %v1256_v9  ;;  %v1337_v0 = vld [vmem:[%s1855_s12 + $0xb0] sm:$0xf0]  ;;  %v1351_v9 = vld [vmem:[%s1855_s12 + $0xc0] sm:$0xf] }
  0x7b   : > { %876 = vmatmul.bf16.vlgmr.msra.gmra.mxu1 %v1260_v10  ;;  %v1340_v6 = vor.u32 %v1532_v63, %v1337_v0  ;;  %v1538_v10 = vld [vmem:[%s1855_s12 + $0xcc] sm:$0xf0] }
  0x7c   : > { %925 = vmatmul.bf16.vlgmr.msra.gmra.mxu2 %v1264_v11  ;;  %v1536_v11 = vld [vmem:[%s1855_s12 + $0xc4] sm:$0xf]  ;;  %v1352_v17 = vor.u32 %v1538_v10, %v1351_v9 }
  0x7d   : > { %974 = vmatmul.bf16.vlgmr.msra.gmra.mxu3 %v1268_v12  ;;  %v1353_v12 = vld [vmem:[%s1855_s12 + $0xd0] sm:$0xf0] }
  0x7e   : > { %v1356_v18 = vor.u32 %v1536_v11, %v1353_v12 }
  0x8a   : > { %832 = vmatmul.bf16.gmra.mxu0 %v1272_v21  ;;  %v1367_v21 = vld [vmem:[%s1855_s12 + $0xe0] sm:$0xf] }
  0x8b   : > { %881 = vmatmul.bf16.gmra.mxu1 %v1276_v22  ;;  %v1542_v22 = vld [vmem:[%s1855_s12 + $0xec] sm:$0xf0] }
  0x8c   : > { %930 = vmatmul.bf16.gmra.mxu2 %v1280_v23  ;;  %v1540_v23 = vld [vmem:[%s1855_s12 + $0xe4] sm:$0xf]  ;;  %v1368_v29 = vor.u32 %v1542_v22, %v1367_v21  ;;  %v360_v22 = vld [vmem:[#allocation2 + $0x68] sm:$0xff] }
  0x8d   : > { %979 = vmatmul.bf16.gmra.mxu3 %v1284_v24  ;;  %v1369_v24 = vld [vmem:[%s1855_s12 + $0xf0] sm:$0xf0] }
  0x8e   : > { %v1372_v30 = vor.u32 %v1540_v23, %v1369_v24 }
  0x9a   : > { %837 = vmatmul.bf16.gmra.mxu0 %v1288_v33 }
  0x9b   : > { %886 = vmatmul.bf16.gmra.mxu1 %v1292_v34 }
  0x9c   : > { %935 = vmatmul.bf16.gmra.mxu2 %v1296_v35 }
  0x9d   : > { %984 = vmatmul.bf16.gmra.mxu3 %v1300_v36 }
  0xaa   : > { %842 = vmatmul.bf16.gmra.mxu0 %v1304_v45 }
  0xab   : > { %891 = vmatmul.bf16.gmra.mxu1 %v1308_v46 }
  0xac   : > { %940 = vmatmul.bf16.gmra.mxu2 %v1312_v47 }
  0xad   : > { %989 = vmatmul.bf16.gmra.mxu3 %v1316_v48 }
  0xba   : > { %847 = vmatmul.bf16.gmra.mxu0 %v1320_v57 }
  0xbb   : > { %896 = vmatmul.bf16.gmra.mxu1 %v1324_v58 }
  0xbc   : > { %945 = vmatmul.bf16.gmra.mxu2 %v1328_v59  ;;  %v357_v59 = vld [vmem:[#allocation2 + $0x58] sm:$0xff] }
  0xbd   : > { %994 = vmatmul.bf16.gmra.mxu3 %v1332_v60 }
  0xca   : > { %852 = vmatmul.bf16.gmra.mxu0 %v1336_v5 }
  0xcb   : > { %901 = vmatmul.bf16.gmra.mxu1 %v1340_v6 }
  0xcc   : > { %950 = vmatmul.bf16.gmra.mxu2 %v1344_v7 }
  0xcd   : > { %999 = vmatmul.bf16.gmra.mxu3 %v1348_v8 }
  0xda   : > { %857 = vmatmul.bf16.gmra.mxu0 %v1352_v17 }
  0xdb   : > { %906 = vmatmul.bf16.gmra.mxu1 %v1356_v18 }
  0xdc   : > { %955 = vmatmul.bf16.gmra.mxu2 %v1360_v19 }
  0xdd   : > { %1004 = vmatmul.bf16.gmra.mxu3 %v1364_v20 }
  0xea   : > { %862 = vmatmul.bf16.gmra.mxu0 %v1368_v29 }
  0xeb   : > { %911 = vmatmul.bf16.gmra.mxu1 %v1372_v30 }
  0xec   : > { %960 = vmatmul.bf16.gmra.mxu2 %v1376_v31  ;;  %v361_v31 = vld [vmem:[#allocation2 + $0x8] sm:$0xff] }
  0xed   : > { %1009 = vmatmul.bf16.gmra.mxu3 %v1380_v32 }
  0xf7   : > { %v828_v33 = vpop.f32.mrf.mxu0 }
  0xf8   : > { %v877_v34 = vpop.f32.mrf.mxu1 }
  0xf9   : > { %v878_v35 = vadd.f32 %v877_v34, %v828_v33 }
  0xff   : > { %v926_v36 = vpop.f32.mrf.mxu2  ;;  %v830_v39 = vpop.f32.mrf.mxu0 }
 0x100   : > { %v975_v37 = vpop.f32.mrf.mxu3  ;;  %v927_v38 = vadd.f32 %v926_v36, %v878_v35  ;;  %v879_v40 = vpop.f32.mrf.mxu1 }
 0x101   : > { %v880_v44 = vadd.f32 %v879_v40, %v830_v39  ;;  %v362_v40 = vld [vmem:[#allocation2 + $0x48] sm:$0xff] }
 0x102   : > { %v976_v42 = vadd.f32 %v975_v37, %v927_v38 }
 0x104   : > { %v1015_v43 = vadd.f32 %v976_v42, %v355_v41 }
 0x106   : > { %1031 = vst [vmem:[#allocation2 + $0x30] sm:$0xff] %v1015_v43 }
 0x107   : > { %v928_v45 = vpop.f32.mrf.mxu2  ;;  %v833_v48 = vpop.f32.mrf.mxu0 }
 0x108   : > { %v977_v46 = vpop.f32.mrf.mxu3  ;;  %v929_v47 = vadd.f32 %v928_v45, %v880_v44  ;;  %v882_v49 = vpop.f32.mrf.mxu1 }
 0x109   : > { %v883_v53 = vadd.f32 %v882_v49, %v833_v48  ;;  %v363_v49 = vld [vmem:[#allocation2 + $0x40] sm:$0xff] }
 0x10a   : > { %v978_v51 = vadd.f32 %v977_v46, %v929_v47 }
 0x10c   : > { %v1016_v52 = vadd.f32 %v978_v51, %v356_v50 }
 0x10e   : > { %1032 = vst [vmem:[#allocation2] sm:$0xff] %v1016_v52 }
 0x10f   : > { %v931_v54 = vpop.f32.mrf.mxu2  ;;  %v835_v57 = vpop.f32.mrf.mxu0 }
 0x110   : > { %v980_v55 = vpop.f32.mrf.mxu3  ;;  %v932_v56 = vadd.f32 %v931_v54, %v883_v53  ;;  %v884_v58 = vpop.f32.mrf.mxu1 }
 0x111   : > { %v885_v62 = vadd.f32 %v884_v58, %v835_v57  ;;  %v364_v58 = vld [vmem:[#allocation2 + $0x20] sm:$0xff] }
 0x112   : > { %v981_v60 = vadd.f32 %v980_v55, %v932_v56 }
 0x114   : > { %v1017_v61 = vadd.f32 %v981_v60, %v357_v59 }
 0x116   : > { %1033 = vst [vmem:[#allocation2 + $0x58] sm:$0xff] %v1017_v61 }
 0x117   : > { %v933_v63 = vpop.f32.mrf.mxu2  ;;  %v838_v2 = vpop.f32.mrf.mxu0 }
 0x118   : > { %v982_v0 = vpop.f32.mrf.mxu3  ;;  %v934_v1 = vadd.f32 %v933_v63, %v885_v62  ;;  %v887_v3 = vpop.f32.mrf.mxu1 }
 0x119   : > { %v888_v7 = vadd.f32 %v887_v3, %v838_v2  ;;  %v365_v3 = vld [vmem:[#allocation2 + $0x10] sm:$0xff] }
 0x11a   : > { %v983_v5 = vadd.f32 %v982_v0, %v934_v1 }
 0x11c   : > { %v1018_v6 = vadd.f32 %v983_v5, %v358_v4 }
 0x11e   : > { %1034 = vst [vmem:[#allocation2 + $0x18] sm:$0xff] %v1018_v6 }
 0x11f   : > { %v936_v8 = vpop.f32.mrf.mxu2  ;;  %v840_v11 = vpop.f32.mrf.mxu0 }
 0x120   : > { %v985_v9 = vpop.f32.mrf.mxu3  ;;  %v937_v10 = vadd.f32 %v936_v8, %v888_v7  ;;  %v889_v12 = vpop.f32.mrf.mxu1 }
 0x121   : > { %v890_v16 = vadd.f32 %v889_v12, %v840_v11  ;;  %v366_v12 = vld [vmem:[#allocation2 + $0x38] sm:$0xff] }
 0x122   : > { %v986_v14 = vadd.f32 %v985_v9, %v937_v10 }
 0x124   : > { %v1019_v15 = vadd.f32 %v986_v14, %v359_v13 }
 0x126   : > { %1035 = vst [vmem:[#allocation2 + $0x50] sm:$0xff] %v1019_v15 }
 0x127   : > { %v938_v17 = vpop.f32.mrf.mxu2  ;;  %v843_v20 = vpop.f32.mrf.mxu0 }
 0x128   : > { %v987_v18 = vpop.f32.mrf.mxu3  ;;  %v939_v19 = vadd.f32 %v938_v17, %v890_v16  ;;  %v892_v21 = vpop.f32.mrf.mxu1 }
 0x129   : > { %v893_v25 = vadd.f32 %v892_v21, %v843_v20  ;;  %v367_v21 = vld [vmem:[#allocation2 + $0x60] sm:$0xff] }
 0x12a   : > { %v988_v23 = vadd.f32 %v987_v18, %v939_v19 }
 0x12c   : > { %v1020_v24 = vadd.f32 %v988_v23, %v360_v22 }
 0x12e   : > { %1036 = vst [vmem:[#allocation2 + $0x68] sm:$0xff] %v1020_v24 }
 0x12f   : > { %v941_v26 = vpop.f32.mrf.mxu2  ;;  %v845_v29 = vpop.f32.mrf.mxu0 }
 0x130   : > { %v990_v27 = vpop.f32.mrf.mxu3  ;;  %v942_v28 = vadd.f32 %v941_v26, %v893_v25  ;;  %v894_v30 = vpop.f32.mrf.mxu1 }
 0x131   : > { %v895_v34 = vadd.f32 %v894_v30, %v845_v29 }
 0x132   : > { %v991_v32 = vadd.f32 %v990_v27, %v942_v28  ;;  %v368_v28 = vld [vmem:[#allocation2 + $0x70] sm:$0xff] }
 0x134   : > { %v1021_v33 = vadd.f32 %v991_v32, %v361_v31 }
 0x136   : > { %1037 = vst [vmem:[#allocation2 + $0x8] sm:$0xff] %v1021_v33 }
 0x137   : > { %v943_v35 = vpop.f32.mrf.mxu2  ;;  %v848_v38 = vpop.f32.mrf.mxu0 }
 0x138   : > { %v992_v36 = vpop.f32.mrf.mxu3  ;;  %v944_v37 = vadd.f32 %v943_v35, %v895_v34  ;;  %v897_v39 = vpop.f32.mrf.mxu1 }
 0x139   : > { %v898_v43 = vadd.f32 %v897_v39, %v848_v38 }
 0x13a   : > { %v993_v41 = vadd.f32 %v992_v36, %v944_v37  ;;  %v369_v37 = vld [vmem:[#allocation2 + $0x78] sm:$0xff] }
 0x13c   : > { %v1022_v42 = vadd.f32 %v993_v41, %v362_v40 }
 0x13e   : > { %1038 = vst [vmem:[#allocation2 + $0x48] sm:$0xff] %v1022_v42 }
 0x13f   : > { %v946_v44 = vpop.f32.mrf.mxu2  ;;  %v850_v47 = vpop.f32.mrf.mxu0 }
 0x140   : > { %v995_v45 = vpop.f32.mrf.mxu3  ;;  %v947_v46 = vadd.f32 %v946_v44, %v898_v43  ;;  %v899_v48 = vpop.f32.mrf.mxu1 }
 0x141   : > { %v900_v52 = vadd.f32 %v899_v48, %v850_v47 }
 0x142   : > { %v996_v50 = vadd.f32 %v995_v45, %v947_v46  ;;  %v370_v45 = vld [vmem:[#allocation2 + $0x28] sm:$0xff] }
 0x144   : > { %v1023_v51 = vadd.f32 %v996_v50, %v363_v49 }
 0x146   : > { %1039 = vst [vmem:[#allocation2 + $0x40] sm:$0xff] %v1023_v51 }
 0x147   : > { %v948_v53 = vpop.f32.mrf.mxu2  ;;  %v853_v56 = vpop.f32.mrf.mxu0 }
 0x148   : > { %v997_v54 = vpop.f32.mrf.mxu3  ;;  %v949_v55 = vadd.f32 %v948_v53, %v900_v52  ;;  %v902_v57 = vpop.f32.mrf.mxu1 }
 0x149   : > { %v903_v61 = vadd.f32 %v902_v57, %v853_v56 }
 0x14a   : > { %v998_v59 = vadd.f32 %v997_v54, %v949_v55 }
 0x14c   : > { %v1024_v60 = vadd.f32 %v998_v59, %v364_v58 }
 0x14e   : > { %1040 = vst [vmem:[#allocation2 + $0x20] sm:$0xff] %v1024_v60 }
 0x14f   : > { %v951_v62 = vpop.f32.mrf.mxu2  ;;  %v855_v1 = vpop.f32.mrf.mxu0 }
 0x150   : > { %v1000_v63 = vpop.f32.mrf.mxu3  ;;  %v952_v0 = vadd.f32 %v951_v62, %v903_v61  ;;  %v904_v2 = vpop.f32.mrf.mxu1 }
 0x151   : > { %v905_v6 = vadd.f32 %v904_v2, %v855_v1 }
 0x152   : > { %v1001_v4 = vadd.f32 %v1000_v63, %v952_v0 }
 0x154   : > { %v1025_v5 = vadd.f32 %v1001_v4, %v365_v3 }
 0x156   : > { %1041 = vst [vmem:[#allocation2 + $0x10] sm:$0xff] %v1025_v5 }
 0x157   : > { %v953_v7 = vpop.f32.mrf.mxu2  ;;  %v858_v10 = vpop.f32.mrf.mxu0 }
 0x158   : > { %v1002_v8 = vpop.f32.mrf.mxu3  ;;  %v954_v9 = vadd.f32 %v953_v7, %v905_v6  ;;  %v907_v11 = vpop.f32.mrf.mxu1 }
 0x159   : > { %v908_v15 = vadd.f32 %v907_v11, %v858_v10 }
 0x15a   : > { %v1003_v13 = vadd.f32 %v1002_v8, %v954_v9 }
 0x15c   : > { %v1026_v14 = vadd.f32 %v1003_v13, %v366_v12 }
 0x15e   : > { %1042 = vst [vmem:[#allocation2 + $0x38] sm:$0xff] %v1026_v14 }
 0x15f   : > { %v956_v16 = vpop.f32.mrf.mxu2  ;;  %v860_v19 = vpop.f32.mrf.mxu0 }
 0x160   : > { %v1005_v17 = vpop.f32.mrf.mxu3  ;;  %v957_v18 = vadd.f32 %v956_v16, %v908_v15  ;;  %v909_v20 = vpop.f32.mrf.mxu1 }
 0x161   : > { %v910_v24 = vadd.f32 %v909_v20, %v860_v19 }
 0x162   : > { %v1006_v22 = vadd.f32 %v1005_v17, %v957_v18 }
 0x164   : > { %v1027_v23 = vadd.f32 %v1006_v22, %v367_v21 }
 0x166   : > { %1043 = vst [vmem:[#allocation2 + $0x60] sm:$0xff] %v1027_v23 }
 0x167   : > { %v958_v25 = vpop.f32.mrf.mxu2  ;;  %v863_v29 = vpop.f32.mrf.mxu0 }
 0x168   : > { %v1007_v26 = vpop.f32.mrf.mxu3  ;;  %v959_v27 = vadd.f32 %v958_v25, %v910_v24  ;;  %v912_v30 = vpop.f32.mrf.mxu1 }
 0x169   : > { %v913_v33 = vadd.f32 %v912_v30, %v863_v29 }
 0x16a   : > { %v1008_v31 = vadd.f32 %v1007_v26, %v959_v27 }
 0x16c   : > { %v1028_v32 = vadd.f32 %v1008_v31, %v368_v28 }
 0x16e   : > { %1044 = vst [vmem:[#allocation2 + $0x70] sm:$0xff] %v1028_v32 }
 0x16f   : > { %v961_v34 = vpop.f32.mrf.mxu2  ;;  %v865_v39 = vpop.f32.mrf.mxu0 }
 0x170   : > { %v1010_v35 = vpop.f32.mrf.mxu3  ;;  %v962_v36 = vadd.f32 %v961_v34, %v913_v33  ;;  %v914_v40 = vpop.f32.mrf.mxu1 }
 0x171   : > { %v915_v42 = vadd.f32 %v914_v40, %v865_v39 }
 0x172   : > { %v1011_v38 = vadd.f32 %v1010_v35, %v962_v36 }
 0x174   : > { %v1029_v41 = vadd.f32 %v1011_v38, %v369_v37 }
 0x176   : > { %1045 = vst [vmem:[#allocation2 + $0x78] sm:$0xff] %v1029_v41 }
 0x177   : > { %v963_v43 = vpop.f32.mrf.mxu2 }
 0x178   : > { %v964_v44 = vadd.f32 %v963_v43, %v915_v42  ;;  %v1012_v46 = vpop.f32.mrf.mxu3 }
 0x17a   : > { %v1013_v47 = vadd.f32 %v1012_v46, %v964_v44  ;;  %1050 = sbr.rel (%p1509_p13) target bundleno = 404 (0x194), region = 63 }
 0x17c   : > { %v1030_v48 = vadd.f32 %v1013_v47, %v370_v45 }
 0x17e   : > { %1046 = vst [vmem:[#allocation2 + $0x28] sm:$0xff] %v1030_v48 }
 0x17f   : > { %v1051_v49 = vld [vmem:[#allocation2 + $0x30] sm:$0xff]  ;;  %v1634_v50 = vld [vmem:[%s1997_s2] ss:$0 sm:$0xff]  ;;  %v1053_v52 = vld [vmem:[#allocation2 + $0x58] sm:$0xff] }
 0x180   : > { %v1052_v51 = vld [vmem:[#allocation2] sm:$0xff]  ;;  %v1054_v53 = vld [vmem:[#allocation2 + $0x18] sm:$0xff]  ;;  %v1071_v54 = vadd.f32 %v1634_v50, %v1051_v49  ;;  %v1073_v56 = vadd.f32 %v1634_v50, %v1053_v52  ;;  %v1055_v58 = vld [vmem:[#allocation2 + $0x50] sm:$0xff] }
 0x181   : > { %v1072_v55 = vadd.f32 %v1634_v50, %v1052_v51  ;;  %v1074_v57 = vadd.f32 %v1634_v50, %v1054_v53  ;;  %v1056_v59 = vld [vmem:[#allocation2 + $0x68] sm:$0xff]  ;;  %v1075_v61 = vadd.f32 %v1634_v50, %v1055_v58  ;;  %v1059_v0 = vld [vmem:[#allocation2 + $0x40] sm:$0xff]  ;;  %v1061_v8 = vld [vmem:[#allocation2 + $0x10] sm:$0xff] }
 0x182   : > { %v1057_v60 = vld [vmem:[#allocation2 + $0x8] sm:$0xff]  ;;  %v1076_v62 = vadd.f32 %v1634_v50, %v1056_v59  ;;  %v1087_v1 = vmax.f32 %v1071_v54, 0.0  ;;  %v1089_v3 = vmax.f32 %v1073_v56, 0.0  ;;  %v1060_v5 = vld [vmem:[#allocation2 + $0x20] sm:$0xff]  ;;  %v1079_v10 = vadd.f32 %v1634_v50, %v1059_v0  ;;  %v1062_v11 = vld [vmem:[#allocation2 + $0x38] sm:$0xff] }
 0x183   : > { %v1058_v63 = vld [vmem:[#allocation2 + $0x48] sm:$0xff]  ;;  %v1088_v2 = vmax.f32 %v1072_v55, 0.0  ;;  %v1077_v4 = vadd.f32 %v1634_v50, %v1057_v60  ;;  %v1090_v6 = vmax.f32 %v1074_v57, 0.0  ;;  %v1091_v9 = vmax.f32 %v1075_v61, 0.0  ;;  %v1063_v14 = vld [vmem:[#allocation2 + $0x60] sm:$0xff]  ;;  %v1064_v17 = vld [vmem:[#allocation2 + $0x70] sm:$0xff] }
 0x184   : > { %v1078_v7 = vadd.f32 %v1634_v50, %v1058_v63  ;;  %1103 = vst [vmem:[%s1853_s30] sm:$0xff] %v1087_v1  ;;  %v1092_v12 = vmax.f32 %v1076_v62, 0.0  ;;  %v1080_v13 = vadd.f32 %v1634_v50, %v1060_v5  ;;  %v1081_v16 = vadd.f32 %v1634_v50, %v1061_v8  ;;  %v1065_v20 = vld [vmem:[#allocation2 + $0x78] sm:$0xff] }
 0x185   : > { %1104 = vst [vmem:[%s1853_s30 + $0x8] sm:$0xff] %v1088_v2  ;;  %v1093_v15 = vmax.f32 %v1077_v4, 0.0  ;;  %v1082_v19 = vadd.f32 %v1634_v50, %v1062_v11  ;;  %v1095_v21 = vmax.f32 %v1079_v10, 0.0  ;;  %v1083_v22 = vadd.f32 %v1634_v50, %v1063_v14  ;;  %v1066_v23 = vld [vmem:[#allocation2 + $0x28] sm:$0xff] }
 0x186   : > { %1105 = vst [vmem:[%s1853_s30 + $0x10] sm:$0xff] %v1089_v3  ;;  %v1094_v18 = vmax.f32 %v1078_v7, 0.0  ;;  %v1096_v24 = vmax.f32 %v1080_v13, 0.0  ;;  %v1084_v25 = vadd.f32 %v1634_v50, %v1064_v17  ;;  %v1097_v26 = vmax.f32 %v1081_v16, 0.0 }
 0x187   : > { %1106 = vst [vmem:[%s1853_s30 + $0x18] sm:$0xff] %v1090_v6  ;;  %v1085_v27 = vadd.f32 %v1634_v50, %v1065_v20  ;;  %v1098_v28 = vmax.f32 %v1082_v19, 0.0  ;;  %v1086_v29 = vadd.f32 %v1634_v50, %v1066_v23  ;;  %v1099_v30 = vmax.f32 %v1083_v22, 0.0 }
 0x188   : > { %1107 = vst [vmem:[%s1853_s30 + $0x20] sm:$0xff] %v1091_v9  ;;  %v1100_v31 = vmax.f32 %v1084_v25, 0.0 }
 0x189   : > { %1108 = vst [vmem:[%s1853_s30 + $0x28] sm:$0xff] %v1092_v12  ;;  %v1101_v32 = vmax.f32 %v1085_v27, 0.0  ;;  %v1102_v33 = vmax.f32 %v1086_v29, 0.0 }
 0x18a   : > { %1109 = vst [vmem:[%s1853_s30 + $0x30] sm:$0xff] %v1093_v15 }
 0x18b   : > { %1110 = vst [vmem:[%s1853_s30 + $0x38] sm:$0xff] %v1094_v18 }
 0x18c   : > { %1111 = vst [vmem:[%s1853_s30 + $0x40] sm:$0xff] %v1095_v21 }
 0x18d   : > { %1112 = vst [vmem:[%s1853_s30 + $0x48] sm:$0xff] %v1096_v24 }
 0x18e   : > { %1113 = vst [vmem:[%s1853_s30 + $0x50] sm:$0xff] %v1097_v26 }
 0x18f   : > { %1114 = vst [vmem:[%s1853_s30 + $0x58] sm:$0xff] %v1098_v28 }
 0x190   : > { %1115 = vst [vmem:[%s1853_s30 + $0x60] sm:$0xff] %v1099_v30 }
 0x191   : > { %1116 = vst [vmem:[%s1853_s30 + $0x68] sm:$0xff] %v1100_v31 }
 0x192   : > { %1117 = vst [vmem:[%s1853_s30 + $0x70] sm:$0xff] %v1101_v32 }
 0x193   : > { %1118 = vst [vmem:[%s1853_s30 + $0x78] sm:$0xff] %v1102_v33 }
 0x194 PF: > { %s13_s18 = sadd.s32 1, %s1689_s18   ;;  %s1999_s12 = smov %s1669_s13 }
 0x195   : > { %p10_p0 = scmp.ge.s32.totalorder %s13_s18, 38   ;;  %s2000_s13 = smov %s1763_s25 }
 0x196   : > { %s2001_s14 = smov %s1681_s16  ;;  %s2002_s15 = smov %s1685_s17 }
 0x197   : > { %s2003_s16 = smov %s2006_s19  ;;  %s2004_s17 = smov %s2010_s20 }
 0x198   :  { %12 = sbr.rel (!%p10_p0) target bundleno = 4 (0x4), region = 104 }

// kernel: cc_alex_fcn4_forward.6
= control target key start
LH: loop header
LB: loop body
LE: loop exit
PB: predicated region body
PF: predicated region fallthrough
CT: control target
= control target key end

     0   :  { %s979_s20 = smov 0   ;;  %s1424_s0 = inlined_call_operand.vmem [shape: f32[2,81,64], index: 0, kind: input, shape index: {}]   ;;  %s1425_s1 = inlined_call_operand.vmem [shape: f32[64,3], index: 1, kind: input, shape index: {}]   ;;  %s1426_s2 = inlined_call_operand.vmem [shape: f32[64,1], index: 2, kind: input, shape index: {}]   ;;  %s1427_s3 = inlined_call_operand.vmem [shape: f32[1,3], index: 3, kind: input, shape index: {}]   ;;  %s1428_s4 = inlined_call_operand.<no memory space> [shape: f32[1,1], index: 4, kind: input, shape index: {}]   ;;  %s1429_s5 = inlined_call_operand.vmem [shape: f32[2,81,3], index: 5, kind: output, shape index: {}]  }
   0x1   :  { %v10_v0 = vstv %s1428_s4 }
   0x2   :  { %11 = vst [vmem:[#allocation2] sm:$0x1] %v10_v0 }
   0x3 LB: > { %s829_s21 = sadd.s32 4294967295, %s943_s20   ;;  %p833_p0 = scmp.ge.s32.totalorder %s943_s20, 1  ;;  %s943_s20 = sphi %s979_s20, %s17_s20  }
   0x4   : > { %p189_p1 = scmp.lt.s32.totalorder %s943_s20, 3 }
   0x6   : > { %p190_p2 = pnand %p833_p0, %p189_p1 }
   0x7   : > { %p217_p3 = scmp.lt.s32.totalorder (!%p190_p2), %s829_s21, 1 }
   0x8   : > { %193 = sbr.rel (%p190_p2) target bundleno = 418 (0x1a2), region = 40 }
   0xd   : > { %v245_v1 = vld [vmem:[%s1425_s1 + $0x38] sm:$0xff]  ;;  %v244_v3 = vld [vmem:[%s1425_s1 + $0x30] sm:$0xff]  ;;  %v243_v5 = vld [vmem:[%s1425_s1 + $0x28] sm:$0xff]  ;;  %s1443_s21 = smov (!%p217_p3, %s829_s21), 1  ;;  %vm250_vm0 = vcmask 523264   ;;  %vm429_vm1 = vcmask 23552  }
   0xe   : > { %v352_v2 = vld [vmem:[%s1426_s2 + $0x38] sm:$0xff]  ;;  %292 = vmatpush.msra.mxu0 %v245_v1  ;;  %860 = vmatpush.msra.mxu2 %v245_v1  ;;  %v351_v4 = vld [vmem:[%s1426_s2 + $0x30] sm:$0xff]  ;;  %v350_v6 = vld [vmem:[%s1426_s2 + $0x28] sm:$0xff]  ;;  %s876_s16 = smul.u32 88, %s1443_s21  ;;  %vm596_vm2 = vcmask 7168   ;;  %vm613_vm3 = vcmask 0  }
   0xf   : > { %365 = vmatpush.msra.mxu1 %v352_v2  ;;  %868 = vmatpush.msra.mxu3 %v352_v2  ;;  %v242_v7 = vld [vmem:[%s1425_s1 + $0x20] sm:$0xff]  ;;  %v241_v9 = vld [vmem:[%s1425_s1 + $0x18] sm:$0xff]  ;;  %v240_v11 = vld [vmem:[%s1425_s1 + $0x10] sm:$0xff]  ;;  %vm460_vm4 = vcmask 16384  }
  0x10   : > { %293 = vmatpush.msra.mxu0 %v244_v3  ;;  %861 = vmatpush.msra.mxu2 %v244_v3  ;;  %v349_v8 = vld [vmem:[%s1426_s2 + $0x20] sm:$0xff]  ;;  %v348_v10 = vld [vmem:[%s1426_s2 + $0x18] sm:$0xff]  ;;  %v347_v12 = vld [vmem:[%s1426_s2 + $0x10] sm:$0xff]  ;;  %s1037_s28 = scalar_lea.vmem %s1424_s0, %s876_s16  ;;  %s1267_s12 = scalar_lea.vmem %s1429_s5, %s876_s16 }
  0x11   : > { %366 = vmatpush.msra.mxu1 %v351_v4  ;;  %869 = vmatpush.msra.mxu3 %v351_v4  ;;  %v239_v13 = vld [vmem:[%s1425_s1 + $0x8] sm:$0xff]  ;;  %v238_v15 = vld [vmem:[%s1425_s1] sm:$0xff]  ;;  %v233_v19 = vld [vmem:[%s1037_s28 + $0x30] sm:$0xff] }
  0x12   : > { %294 = vmatpush.msra.mxu0 %v243_v5  ;;  %862 = vmatpush.msra.mxu2 %v243_v5  ;;  %v346_v14 = vld [vmem:[%s1426_s2 + $0x8] sm:$0xff]  ;;  %v345_v16 = vld [vmem:[%s1426_s2] sm:$0xff]  ;;  %v234_v21 = vld [vmem:[%s1037_s28 + $0x38] sm:$0xff] }
  0x13   : > { %367 = vmatpush.msra.mxu1 %v350_v6  ;;  %870 = vmatpush.msra.mxu3 %v350_v6  ;;  %v227_v17 = vld [vmem:[%s1037_s28] sm:$0xff]  ;;  %v232_v18 = vld [vmem:[%s1037_s28 + $0x28] sm:$0xff]  ;;  %v229_v22 = vld [vmem:[%s1037_s28 + $0x10] sm:$0xff] }
  0x14   : > { %295 = vmatpush.msra.mxu0 %v242_v7  ;;  %863 = vmatpush.msra.mxu2 %v242_v7  ;;  %v228_v20 = vld [vmem:[%s1037_s28 + $0x8] sm:$0xff]  ;;  %v235_v23 = vld [vmem:[%s1037_s28 + $0x40] sm:$0xff]  ;;  %v230_v24 = vld [vmem:[%s1037_s28 + $0x18] sm:$0xff] }
  0x15   : > { %368 = vmatpush.msra.mxu1 %v349_v8  ;;  %871 = vmatpush.msra.mxu3 %v349_v8  ;;  %v236_v25 = vld [vmem:[%s1037_s28 + $0x48] sm:$0xff]  ;;  %v231_v26 = vld [vmem:[%s1037_s28 + $0x20] sm:$0xff]  ;;  %v237_v27 = vld [vmem:[%s1037_s28 + $0x50] sm:$0x1] }
  0x16   : > { %296 = vmatpush.msra.mxu0 %v241_v9  ;;  %864 = vmatpush.msra.mxu2 %v241_v9  ;;  %v1081_v28 = vld [vmem:[%s1427_s3] ss:$0 sm:$0xff] }
  0x17   : > { %369 = vmatpush.msra.mxu1 %v348_v10  ;;  %872 = vmatpush.msra.mxu3 %v348_v10  ;;  %v890_v3 = vld [vmem:[#allocation2] ss:$0 sm:$0xff] }
  0x18   : > { %297 = vmatpush.msra.mxu0 %v240_v11  ;;  %865 = vmatpush.msra.mxu2 %v240_v11 }
  0x19   : > { %370 = vmatpush.msra.mxu1 %v347_v12  ;;  %873 = vmatpush.msra.mxu3 %v347_v12 }
  0x1a   : > { %298 = vmatpush.msra.mxu0 %v239_v13  ;;  %866 = vmatpush.msra.mxu2 %v239_v13 }
  0x1b   : > { %371 = vmatpush.msra.mxu1 %v346_v14  ;;  %874 = vmatpush.msra.mxu3 %v346_v14 }
  0x1c   : > { %299 = vmatpush.msra.mxu0 %v238_v15  ;;  %867 = vmatpush.msra.mxu2 %v238_v15 }
  0x1d   : > { %372 = vmatpush.msra.mxu1 %v345_v16  ;;  %875 = vmatpush.msra.mxu3 %v345_v16 }
  0x1e   : > { %836 = vmatmul.msk.f32.vlgmr.msra.gmra.mxu0 %vm250_vm0, %v227_v17  ;;  %841 = vmatmul.msk.f32.vlgmr.msra.gmra.mxu2 %vm250_vm0, %v232_v18 }
  0x1f   : > { %847 = vmatmul.msk.f32.vlgmr.msra.gmra.mxu1 %vm250_vm0, %v227_v17  ;;  %853 = vmatmul.msk.f32.vlgmr.msra.gmra.mxu3 %vm250_vm0, %v233_v19 }
  0x26   : > { %837 = vmatmul.msk.f32.gmra.mxu0 %vm250_vm0, %v228_v20  ;;  %842 = vmatmul.msk.f32.gmra.mxu2 %vm250_vm0, %v233_v19 }
  0x27   : > { %848 = vmatmul.msk.f32.gmra.mxu1 %vm250_vm0, %v228_v20  ;;  %854 = vmatmul.msk.f32.gmra.mxu3 %vm250_vm0, %v234_v21 }
  0x2e   : > { %838 = vmatmul.msk.f32.gmra.mxu0 %vm250_vm0, %v229_v22  ;;  %843 = vmatmul.msk.f32.gmra.mxu2 %vm250_vm0, %v234_v21 }
  0x2f   : > { %849 = vmatmul.msk.f32.gmra.mxu1 %vm250_vm0, %v229_v22  ;;  %855 = vmatmul.msk.f32.gmra.mxu3 %vm250_vm0, %v235_v23 }
  0x36   : > { %844 = vmatmul.msk.f32.gmra.mxu2 %vm250_vm0, %v235_v23  ;;  %839 = vmatmul.msk.f32.gmra.mxu0 %vm250_vm0, %v230_v24 }
  0x37   : > { %850 = vmatmul.msk.f32.gmra.mxu1 %vm250_vm0, %v230_v24  ;;  %856 = vmatmul.msk.f32.gmra.mxu3 %vm250_vm0, %v236_v25 }
  0x3e   : > { %845 = vmatmul.msk.f32.gmra.mxu2 %vm250_vm0, %v236_v25  ;;  %840 = vmatmul.msk.f32.gmra.mxu0 %vm250_vm0, %v231_v26 }
  0x3f   : > { %851 = vmatmul.msk.f32.gmra.mxu1 %vm250_vm0, %v231_v26  ;;  %857 = vmatmul.msk.f32.gmra.mxu3 %vm250_vm0, %v237_v27 }
  0x46   : > { %846 = vmatmul.msk.f32.gmra.mxu2 %vm250_vm0, %v237_v27 }
  0x47   : > { %852 = vmatmul.msk.f32.gmra.mxu1 %vm250_vm0, %v232_v18 }
  0x9b   : > { %v301_v29 = vpop.f32.mrf.mxu0 }
  0x9c   : > { %v302_v30 = vadd.f32 %v1081_v28, %v301_v29  ;;  %v374_v31 = vpop.f32.mrf.mxu1 }
  0x9d   : > { %v1123_v9 = vadd.f32 %v890_v3, %v374_v31 }
  0x9e   : > { %v1084_v32 = vmax.f32 %v302_v30, 0.0 }
  0x9f   : > { %v407_v20 = vmax.f32 %v1123_v9, 0.0 }
  0xa0   : > { %v418_v33 = vmul.f32 %v1084_v32, %v1084_v32 }
  0xa1   : > { %v316_v34 = vpop.f32.mrf.mxu2 }
  0xa2   : > { %v317_v35 = vadd.f32 %v1081_v28, %v316_v34  ;;  %v392_v36 = vpop.f32.mrf.mxu3  ;;  %v430_v37 = vsel %vm429_vm1, %v418_v33, 0.0 }
  0xa3   : > { %v304_v38 = vpop.f32.mrf.mxu0  ;;  %431 = vadd.xlane.f32.xlu0 %v430_v37  ;;  %v1134_v17 = vadd.f32 %v890_v3, %v392_v36 }
  0xa4   : > { %v1090_v39 = vmax.f32 %v317_v35, 0.0  ;;  %v305_v40 = vadd.f32 %v1081_v28, %v304_v38  ;;  %v377_v41 = vpop.f32.mrf.mxu1  ;;  %v597_v35 = vsel %vm596_vm2, %v407_v20, -inf }
  0xa5   : > { %v1141_v21 = vadd.f32 %v890_v3, %v377_v41  ;;  %v413_v29 = vmax.f32 %v1134_v17, 0.0 }
  0xa6   : > { %v1093_v42 = vmax.f32 %v305_v40, 0.0  ;;  %v423_v43 = vmul.f32 %v1090_v39, %v1090_v39 }
  0xa7   : > { %v408_v40 = vmax.f32 %v1141_v21, 0.0 }
  0xa8   : > { %v445_v44 = vsel %vm429_vm1, %v423_v43, 0.0  ;;  %v419_v45 = vmul.f32 %v1093_v42, %v1093_v42 }
  0xa9   : > { %v319_v46 = vpop.f32.mrf.mxu2  ;;  %446 = vadd.xlane.f32.xlu2 %v445_v44 }
  0xaa   : > { %v320_v47 = vadd.f32 %v1081_v28, %v319_v46  ;;  %v395_v48 = vpop.f32.mrf.mxu3  ;;  %v433_v49 = vsel %vm429_vm1, %v419_v45, 0.0 }
  0xab   : > { %v307_v50 = vpop.f32.mrf.mxu0  ;;  %434 = vadd.xlane.f32.xlu0 %v433_v49  ;;  %v1150_v30 = vadd.f32 %v890_v3, %v395_v48  ;;  %v605_v49 = vsel %vm596_vm2, %v413_v29, -inf }
  0xac   : > { %v1102_v51 = vmax.f32 %v320_v47, 0.0  ;;  %v308_v52 = vadd.f32 %v1081_v28, %v307_v50  ;;  %v380_v53 = vpop.f32.mrf.mxu1 }
  0xad   : > { %v1125_v11 = vadd.f32 %v890_v3, %v380_v53  ;;  %v414_v50 = vmax.f32 %v1150_v30, 0.0 }
  0xae   : > { %v1105_v54 = vmax.f32 %v308_v52, 0.0  ;;  %v424_v55 = vmul.f32 %v1102_v51, %v1102_v51 }
  0xaf   : > { %v409_v22 = vmax.f32 %v1125_v11, 0.0 }
  0xb0   : > { %v420_v56 = vmul.f32 %v1105_v54, %v1105_v54  ;;  %v448_v57 = vsel %vm429_vm1, %v424_v55, 0.0 }
  0xb1   : > { %v322_v58 = vpop.f32.mrf.mxu2  ;;  %v599_v41 = vsel %vm596_vm2, %v409_v22, -inf }
  0xb2   : > { %v323_v59 = vadd.f32 %v1081_v28, %v322_v58  ;;  %v398_v60 = vpop.f32.mrf.mxu3  ;;  %v436_v61 = vsel %vm429_vm1, %v420_v56, 0.0 }
  0xb3   : > { %437 = vadd.xlane.f32.xlu1 %v436_v61  ;;  %449 = vadd.xlane.f32.xlu0 %v448_v57  ;;  %v310_v62 = vpop.f32.mrf.mxu0  ;;  %v1158_v36 = vadd.f32 %v890_v3, %v398_v60 }
  0xb4   : > { %v1114_v63 = vmax.f32 %v323_v59, 0.0  ;;  %v383_v0 = vpop.f32.mrf.mxu1  ;;  %v311_v1 = vadd.f32 %v1081_v28, %v310_v62  ;;  %v606_v59 = vmax.f32 %v599_v41, %v605_v49  ;;  %v598_v62 = vsel %vm596_vm2, %v408_v40, -inf }
  0xb5   : > { %v1146_v25 = vadd.f32 %v890_v3, %v383_v0  ;;  %v415_v55 = vmax.f32 %v1158_v36, 0.0 }
  0xb6   : > { %v425_v2 = vmul.f32 %v1114_v63, %v1114_v63  ;;  %v1119_v4 = vmax.f32 %v311_v1, 0.0 }
  0xb7   : > { %v410_v45 = vmax.f32 %v1146_v25, 0.0 }
  0xb8   : > { %v451_v5 = vsel %vm429_vm1, %v425_v2, 0.0  ;;  %v421_v15 = vmul.f32 %v1119_v4, %v1119_v4 }
  0xb9   : > { %v325_v6 = vpop.f32.mrf.mxu2  ;;  %v600_v0 = vsel %vm596_vm2, %v410_v45, -inf }
  0xba   : > { %v326_v7 = vadd.f32 %v1081_v28, %v325_v6  ;;  %v401_v8 = vpop.f32.mrf.mxu3  ;;  %v439_v24 = vsel %vm429_vm1, %v421_v15, 0.0 }
  0xbb   : > { %452 = vadd.xlane.f32.xlu1 %v451_v5  ;;  %v313_v10 = vpop.f32.mrf.mxu0  ;;  %v1160_v37 = vadd.f32 %v890_v3, %v401_v8  ;;  %v607_v8 = vsel %vm596_vm2, %v414_v50, -inf }
  0xbc   : > { %v1127_v12 = vmax.f32 %v326_v7, 0.0  ;;  %v386_v13 = vpop.f32.mrf.mxu1  ;;  %v314_v14 = vadd.f32 %v1081_v28, %v313_v10  ;;  %v945_v7 = vmov 0   ;;  %v609_v10 = vsel %vm596_vm2, %v415_v55, -inf }
  0xbd   : > { %v1132_v16 = vadd.f32 %v890_v3, %v386_v13  ;;  %v416_v56 = vmax.f32 %v1160_v37, 0.0  ;;  %888 = vset.pattern.permute.xlu1 %v945_v7  ;;  %887 = vset.pattern.permute.xlu0 %v945_v7 }
  0xbe   : > { %v426_v18 = vmul.f32 %v1127_v12, %v1127_v12  ;;  %v1138_v19 = vmax.f32 %v314_v14, 0.0  ;;  %886 = vset.pattern.permute.xlu2 %v945_v7  ;;  %v608_v14 = vmax.f32 %v600_v0, %v607_v8 }
  0xbf   : > { %v411_v26 = vmax.f32 %v1132_v16, 0.0  ;;  %v611_v13 = vsel %vm596_vm2, %v416_v56, -inf }
  0xc0   : > { %v454_v23 = vsel %vm429_vm1, %v426_v18, 0.0  ;;  %v422_v34 = vmul.f32 %v1138_v19, %v1138_v19 }
  0xc1   : > { %v328_v27 = vpop.f32.mrf.mxu2  ;;  %455 = vadd.xlane.f32.xlu2 %v454_v23  ;;  %v601_v46 = vsel %vm596_vm2, %v411_v26, -inf }
  0xc2   : > { %v329_v31 = vadd.f32 %v1081_v28, %v328_v27  ;;  %v404_v33 = vpop.f32.mrf.mxu3  ;;  %v442_v52 = vsel %vm429_vm1, %v422_v34, 0.0  ;;  %v602_v60 = vmax.f32 %v597_v35, %v601_v46 }
  0xc3   : > { %v1162_v38 = vadd.f32 %v890_v3, %v404_v33  ;;  %440 = vadd.xlane.f32.xlu1 %v439_v24 }
  0xc4   : > { %v1168_v43 = vmax.f32 %v329_v31, 0.0  ;;  %v389_v44 = vpop.f32.mrf.mxu1  ;;  %v610_v15 = vmax.f32 %v602_v60, %v609_v10 }
  0xc5   : > { %v417_v47 = vmax.f32 %v1162_v38, 0.0  ;;  %v390_v48 = vadd.f32 %v890_v3, %v389_v44 }
  0xc6   : > { %v427_v53 = vmul.f32 %v1168_v43, %v1168_v43 }
  0xc7   : > { %v614_v57 = vsel %vm613_vm3, %v417_v47, -inf  ;;  %v412_v58 = vmax.f32 %v390_v48, 0.0 }
  0xc8   : > { %v457_v61 = vsel %vm429_vm1, %v427_v53, 0.0  ;;  %v615_v3 = vmax.f32 %v606_v59, %v614_v57 }
  0xc9   : > { %v603_v1 = vsel %vm596_vm2, %v412_v58, -inf  ;;  %v331_v2 = vpop.f32.mrf.mxu2  ;;  %443 = vadd.xlane.f32.xlu2 %v442_v52  ;;  %458 = vadd.xlane.f32.xlu0 %v457_v61 }
  0xca   : > { %v604_v5 = vmax.f32 %v598_v62, %v603_v1  ;;  %v332_v6 = vadd.f32 %v1081_v28, %v331_v2  ;;  %v617_v23 = vmax.f32 %v615_v3, %v608_v14 }
  0xcc   : > { %v612_v18 = vmax.f32 %v604_v5, %v611_v13  ;;  %v1197_v21 = vmax.f32 %v332_v6, 0.0 }
  0xce   : > { %v616_v28 = vmax.f32 %v610_v15, %v612_v18  ;;  %v428_v24 = vmul.f32 %v1197_v21, %v1197_v21 }
  0xd0   : > { %v618_v25 = vmax.f32 %v616_v28, %v617_v23  ;;  %v461_v27 = vsel %vm460_vm4, %v428_v24, 0.0 }
  0xd1   : > { %462 = vadd.xlane.f32.xlu1 %v461_v27 }
  0xd2   : > { %v619_v30 = vrot.slane %v618_v25, 4 }
  0xd4   : > { %v620_v31 = vmax.f32 %v618_v25, %v619_v30 }
  0xd6   : > { %v621_v33 = vrot.slane %v620_v31, 2 }
  0xd8   : > { %v622_v34 = vmax.f32 %v620_v31, %v621_v33 }
  0xda   : > { %v623_v35 = vrot.slane %v622_v34, 1 }
  0xdc   : > { %v624_v36 = vmax.f32 %v622_v34, %v623_v35 }
  0xde   : > { %v625_v41 = vsub.f32 %v407_v20, %v624_v36  ;;  %v626_v44 = vsub.f32 %v408_v40, %v624_v36  ;;  %v627_v46 = vsub.f32 %v409_v22, %v624_v36  ;;  %v628_v48 = vsub.f32 %v410_v45, %v624_v36 }
  0xdf   : > { %v629_v49 = vsub.f32 %v411_v26, %v624_v36  ;;  %v630_v59 = vsub.f32 %v412_v58, %v624_v36  ;;  %v631_v61 = vsub.f32 %v413_v29, %v624_v36  ;;  %v632_v40 = vsub.f32 %v414_v50, %v624_v36 }
  0xe0   : > { %v636_v52 = vmul.f32 1.442695, %v625_v41  ;;  %v638_v53 = vmul.f32 1.442695, %v626_v44  ;;  %v640_v57 = vmul.f32 1.442695, %v627_v46  ;;  %v633_v11 = vsub.f32 %v415_v55, %v624_v36 }
  0xe1   : > { %v642_v60 = vmul.f32 1.442695, %v628_v48  ;;  %v644_v9 = vmul.f32 1.442695, %v629_v49  ;;  %v646_v20 = vmul.f32 1.442695, %v630_v59  ;;  %v634_v45 = vsub.f32 %v416_v56, %v624_v36 }
  0xe2   : > { %891 = vpow2.f32 %v636_v52  ;;  %v648_v22 = vmul.f32 1.442695, %v631_v61  ;;  %v650_v58 = vmul.f32 1.442695, %v632_v40  ;;  %v635_v50 = vsub.f32 %v417_v47, %v624_v36 }
  0xe3   : > { %893 = vpow2.f32 %v638_v53  ;;  %v652_v55 = vmul.f32 1.442695, %v633_v11  ;;  %v654_v5 = vmul.f32 1.442695, %v634_v45 }
  0xe4   : > { %895 = vpow2.f32 %v640_v57  ;;  %v656_v7 = vmul.f32 1.442695, %v635_v50 }
  0xe5   : > { %897 = vpow2.f32 %v642_v60 }
  0xe6   : > { %899 = vpow2.f32 %v644_v9 }
  0xe7   : > { %901 = vpow2.f32 %v646_v20 }
  0xe8   : > { %v892_v16 = vpop.eup %891  ;;  %903 = vpow2.f32 %v648_v22 }
  0xe9   : > { %v894_v26 = vpop.eup %893  ;;  %v658_v62 = vsel %vm596_vm2, %v892_v16, 0.0  ;;  %905 = vpow2.f32 %v650_v58 }
  0xea   : > { %v896_v17 = vpop.eup %895  ;;  %v659_v29 = vsel %vm596_vm2, %v894_v26, 0.0  ;;  %907 = vpow2.f32 %v652_v55 }
  0xeb   : > { %v898_v0 = vpop.eup %897  ;;  %v660_v1 = vadd.f32 %v659_v29, %v658_v62  ;;  %v661_v2 = vsel %vm596_vm2, %v896_v17, 0.0  ;;  %909 = vpow2.f32 %v654_v5 }
  0xec   : > { %v900_v3 = vpop.eup %899  ;;  %v663_v56 = vsel %vm596_vm2, %v898_v0, 0.0  ;;  %911 = vpow2.f32 %v656_v7 }
  0xed   : > { %v662_v37 = vadd.f32 %v661_v2, %v660_v1  ;;  %v902_v6 = vpop.eup %901  ;;  %v665_v10 = vsel %vm596_vm2, %v900_v3, 0.0 }
  0xee   : > { %v904_v13 = vpop.eup %903  ;;  %v667_v47 = vsel %vm596_vm2, %v902_v6, 0.0 }
  0xef   : > { %v664_v8 = vadd.f32 %v663_v56, %v662_v37  ;;  %v906_v14 = vpop.eup %905  ;;  %v669_v18 = vsel %vm596_vm2, %v904_v13, 0.0 }
  0xf0   : > { %v908_v23 = vpop.eup %907  ;;  %v671_v24 = vsel %vm596_vm2, %v906_v14, 0.0 }
  0xf1   : > { %v666_v38 = vadd.f32 %v665_v10, %v664_v8  ;;  %v910_v25 = vpop.eup %909  ;;  %v673_v30 = vsel %vm596_vm2, %v908_v23, 0.0 }
  0xf2   : > { %v912_v31 = vpop.eup %911  ;;  %v675_v34 = vsel %vm596_vm2, %v910_v25, 0.0 }
  0xf3   : > { %v668_v15 = vadd.f32 %v667_v47, %v666_v38  ;;  %v677_v36 = vsel %vm613_vm3, %v912_v31, 0.0 }
  0xf5   : > { %v670_v28 = vadd.f32 %v669_v18, %v668_v15 }
  0xf7   : > { %v672_v27 = vadd.f32 %v671_v24, %v670_v28 }
  0xf9   : > { %v674_v33 = vadd.f32 %v673_v30, %v672_v27 }
  0xfb   : > { %v676_v35 = vadd.f32 %v675_v34, %v674_v33 }
  0xfd   : > { %v678_v41 = vadd.f32 %v677_v36, %v676_v35 }
  0xff   : > { %v679_v44 = vrot.slane %v678_v41, 4 }
 0x101   : > { %v680_v46 = vadd.f32 %v679_v44, %v678_v41 }
 0x103   : > { %v681_v48 = vrot.slane %v680_v46, 2 }
 0x105   : > { %v682_v49 = vadd.f32 %v681_v48, %v680_v46 }
 0x107   : > { %v683_v52 = vrot.slane %v682_v49, 1 }
 0x109   : > { %v684_v53 = vadd.f32 %v683_v52, %v682_v49 }
 0x10b   : > { %913 = vrcp.f32 %v684_v53 }
 0x111   : > { %v914_v57 = vpop.eup %913 }
 0x112   : > { %v686_v59 = vmul.f32 %v914_v57, %v892_v16  ;;  %v688_v60 = vmul.f32 %v914_v57, %v896_v17  ;;  %v687_v61 = vmul.f32 %v914_v57, %v894_v26  ;;  %v689_v9 = vmul.f32 %v914_v57, %v898_v0 }
 0x113   : > { %v691_v20 = vmul.f32 %v914_v57, %v902_v6  ;;  %v694_v40 = vmul.f32 %v914_v57, %v908_v23  ;;  %v690_v11 = vmul.f32 %v914_v57, %v900_v3  ;;  %v693_v22 = vmul.f32 %v914_v57, %v906_v14 }
 0x114   : > { %699 = vperm.xlu2 %886, %v686_v59   ;;  %709 = vperm.xlu1 %888, %v688_v60   ;;  %v692_v45 = vmul.f32 %v914_v57, %v904_v13  ;;  %v696_v58 = vmul.f32 %v914_v57, %v912_v31  ;;  %v695_v16 = vmul.f32 %v914_v57, %v910_v25 }
 0x115   : > { %704 = vperm.xlu0 %887, %v687_v61  }
 0x116   : > { %v432_v29 = vpop.xlane.xlu0 %431 }
 0x117   : > { %v464_v0 = vmax.f32 %v432_v29, 1e-24 }
 0x119   : > { %915 = vrsqrt.f32 %v464_v0  ;;  %vm481_vm5 = vweird.f32 %v464_v0 }
 0x11c   : > { %714 = vperm.xlu2 %886, %v689_v9   ;;  %724 = vperm.xlu1 %888, %v691_v20   ;;  %v447_v62 = vpop.xlane.xlu2 %446 }
 0x11d   : > { %739 = vperm.xlu0 %887, %v694_v40   ;;  %v1241_v30 = vmax.f32 %v447_v62, 1e-24 }
 0x11e   : > { %v435_v3 = vpop.xlane.xlu0 %434 }
 0x11f   : > { %v916_v2 = vpop.eup %915  ;;  %v1232_v15 = vmax.f32 %v435_v3, 1e-24 }
 0x120   : > { %v476_v5 = vmul.f32 %v916_v2, %v464_v0  ;;  %vm482_vm6 = vweird.f32 %v916_v2 }
 0x121   : > { %vm483_vm7 = vmor %vm481_vm5, %vm482_vm6  ;;  %vm491_vm3 = vweird.f32 %v1232_v15 }
 0x122   : > { %v477_v6 = vmul.f32 %v916_v2, %v476_v5 }
 0x124   : > { %719 = vperm.xlu2 %886, %v690_v11   ;;  %734 = vperm.xlu1 %888, %v693_v22   ;;  %v478_v8 = vmul.f32 0.5, %v477_v6 }
 0x126   : > { %v438_v26 = vpop.xlane.xlu1 %437  ;;  %v450_v10 = vpop.xlane.xlu0 %449  ;;  %v479_v14 = vsub.f32 1.5, %v478_v8 }
 0x127   : > { %v1228_v38 = vmax.f32 %v438_v26, 1e-24  ;;  %v1230_v47 = vmax.f32 %v450_v10, 1e-24 }
 0x128   : > { %v480_v27 = vmul.f32 %v916_v2, %v479_v14 }
 0x129   : > { %vm501_vm14 = vweird.f32 %v1228_v38  ;;  %vm541_vm0 = vweird.f32 %v1230_v47 }
 0x12a   : > { %v484_v41 = vsel %vm483_vm7, %v916_v2, %v480_v27 }
 0x12b   : > { %v585_v49 = vmul.f32 %v484_v41, %v1084_v32 }
 0x12c   : > { %729 = vperm.xlu2 %886, %v692_v45   ;;  %749 = vperm.xlu1 %888, %v696_v58  }
 0x12e   : > { %v453_v17 = vpop.xlane.xlu1 %452 }
 0x12f   : > { %v1273_v9 = vmax.f32 %v453_v17, 1e-24 }
 0x134   : > { %744 = vperm.xlu2 %886, %v695_v16   ;;  %v456_v50 = vpop.xlane.xlu2 %455 }
 0x135   : > { %v1247_v34 = vmax.f32 %v456_v50, 1e-24 }
 0x136   : > { %v441_v55 = vpop.xlane.xlu1 %440 }
 0x137   : > { %v467_v1 = vmax.f32 %v441_v55, 1e-24 }
 0x139   : > { %917 = vrsqrt.f32 %v467_v1  ;;  %vm511_vm8 = vweird.f32 %v467_v1 }
 0x13c   : > { %v444_v37 = vpop.xlane.xlu2 %443  ;;  %v459_v25 = vpop.xlane.xlu0 %458 }
 0x13d   : > { %v1225_v56 = vmax.f32 %v444_v37, 1e-24  ;;  %v1243_v31 = vmax.f32 %v459_v25, 1e-24 }
 0x13f   : > { %v918_v7 = vpop.eup %917  ;;  %919 = vrsqrt.f32 %v1225_v56  ;;  %vm521_vm11 = vweird.f32 %v1225_v56 }
 0x140   : > { %v506_v13 = vmul.f32 %v918_v7, %v467_v1  ;;  %921 = vrsqrt.f32 %v1228_v38  ;;  %vm512_vm9 = vweird.f32 %v918_v7 }
 0x141   : > { %923 = vrsqrt.f32 %v1230_v47  ;;  %vm513_vm10 = vmor %vm511_vm8, %vm512_vm9  ;;  %vm531_vm9 = vweird.f32 %v1241_v30 }
 0x142   : > { %v507_v18 = vmul.f32 %v918_v7, %v506_v13  ;;  %925 = vrsqrt.f32 %v1232_v15 }
 0x143   : > { %927 = vrsqrt.f32 %v1241_v30 }
 0x144   : > { %v508_v28 = vmul.f32 0.5, %v507_v18  ;;  %929 = vrsqrt.f32 %v1243_v31  ;;  %v463_v50 = vpop.xlane.xlu1 %462 }
 0x145   : > { %v1234_v23 = vpop.eup %919  ;;  %931 = vrsqrt.f32 %v1247_v34 }
 0x146   : > { %v516_v24 = vmul.f32 %v1234_v23, %v1225_v56  ;;  %v1245_v33 = vpop.eup %921  ;;  %v509_v35 = vsub.f32 1.5, %v508_v28  ;;  %vm522_vm12 = vweird.f32 %v1234_v23  ;;  %933 = vrsqrt.f32 %v1273_v9 }
 0x147   : > { %v1250_v44 = vpop.eup %923  ;;  %v496_v48 = vmul.f32 %v1245_v33, %v1228_v38  ;;  %vm1295_vm13 = vmor %vm521_vm11, %vm522_vm12  ;;  %v1300_v56 = vmax.f32 %v463_v50, 1e-24  ;;  %vm502_vm15 = vweird.f32 %v1245_v33  ;;  %vm571_vm11 = vweird.f32 %v1243_v31 }
 0x148   : > { %v517_v36 = vmul.f32 %v1234_v23, %v516_v24  ;;  %v1253_v46 = vpop.eup %925  ;;  %v536_v52 = vmul.f32 %v1250_v44, %v1230_v47  ;;  %v510_v59 = vmul.f32 %v918_v7, %v509_v35  ;;  %vm542_vm2 = vweird.f32 %v1250_v44  ;;  %vm1325_vm6 = vmor %vm501_vm14, %vm502_vm15 }
 0x149   : > { %v486_v60 = vmul.f32 %v1253_v46, %v1232_v15  ;;  %v1271_v32 = vpop.eup %927  ;;  %v497_v20 = vmul.f32 %v1245_v33, %v496_v48  ;;  %935 = vrsqrt.f32 %v1300_v56  ;;  %vm492_vm5 = vweird.f32 %v1253_v46  ;;  %vm1329_vm7 = vmor %vm541_vm0, %vm542_vm2 }
 0x14a   : > { %v518_v53 = vmul.f32 0.5, %v517_v36  ;;  %v537_v40 = vmul.f32 %v1250_v44, %v536_v52  ;;  %v514_v22 = vsel %vm513_vm10, %v918_v7, %v510_v59  ;;  %v1279_v45 = vpop.eup %929  ;;  %v526_v26 = vmul.f32 %v1271_v32, %v1241_v30  ;;  %vm1336_vm8 = vmor %vm491_vm3, %vm492_vm5 }
 0x14b   : > { %v487_v58 = vmul.f32 %v1253_v46, %v486_v60  ;;  %v1282_v16 = vpop.eup %931  ;;  %v588_v62 = vmul.f32 %v514_v22, %v1119_v4  ;;  %v498_v17 = vmul.f32 0.5, %v497_v20  ;;  %v566_v0 = vmul.f32 %v1279_v45, %v1243_v31 }
 0x14c   : > { %v519_v11 = vsub.f32 1.5, %v518_v53  ;;  %v538_v29 = vmul.f32 0.5, %v537_v40  ;;  %v556_v3 = vmul.f32 %v1282_v16, %v1247_v34  ;;  %v527_v4 = vmul.f32 %v1271_v32, %v526_v26  ;;  %v1308_v13 = vpop.eup %933 }
 0x14d   : > { %v488_v2 = vmul.f32 0.5, %v487_v58  ;;  %v499_v6 = vsub.f32 1.5, %v498_v17  ;;  %v567_v8 = vmul.f32 %v1279_v45, %v566_v0  ;;  %v546_v24 = vmul.f32 %v1308_v13, %v1273_v9 }
 0x14e   : > { %v520_v1 = vmul.f32 %v1234_v23, %v519_v11  ;;  %v539_v7 = vsub.f32 1.5, %v538_v29  ;;  %v557_v18 = vmul.f32 %v1282_v16, %v556_v3  ;;  %v528_v28 = vmul.f32 0.5, %v527_v4 }
 0x14f   : > { %v489_v14 = vsub.f32 1.5, %v488_v2  ;;  %v568_v25 = vmul.f32 0.5, %v567_v8  ;;  %v500_v47 = vmul.f32 %v1245_v33, %v499_v6  ;;  %v547_v38 = vmul.f32 %v1308_v13, %v546_v24 }
 0x150   : > { %v524_v10 = vsel %vm1295_vm13, %v1234_v23, %v520_v1  ;;  %v540_v35 = vmul.f32 %v1250_v44, %v539_v7  ;;  %v558_v41 = vmul.f32 0.5, %v557_v18  ;;  %v529_v52 = vsub.f32 1.5, %v528_v28 }
 0x151   : > { %v589_v23 = vmul.f32 %v524_v10, %v1138_v19  ;;  %v504_v60 = vsel %vm1325_vm6, %v1245_v33, %v500_v47  ;;  %vm532_vm10 = vweird.f32 %v1271_v32  ;;  %vm572_vm12 = vweird.f32 %v1279_v45 }
 0x152   : > { %v544_v59 = vsel %vm1329_vm7, %v1250_v44, %v540_v35  ;;  %v559_v15 = vsub.f32 1.5, %v558_v41  ;;  %v530_v44 = vmul.f32 %v1271_v32, %v529_v52  ;;  %vm561_vm13 = vweird.f32 %v1247_v34  ;;  %vm1369_vm15 = vmor %vm531_vm9, %vm532_vm10 }
 0x153   : > { %v591_v33 = vmul.f32 %v544_v59, %v1102_v51  ;;  %v587_v40 = vmul.f32 %v504_v60, %v1105_v54  ;;  %vm562_vm14 = vweird.f32 %v1282_v16  ;;  %v548_v11 = vmul.f32 0.5, %v547_v38  ;;  %vm573_vm0 = vmor %vm571_vm11, %vm572_vm12 }
 0x154   : > { %v560_v0 = vmul.f32 %v1282_v16, %v559_v15  ;;  %vm1380_vm2 = vmor %vm561_vm13, %vm562_vm14  ;;  %v534_v31 = vsel %vm1369_vm15, %v1271_v32, %v530_v44  ;;  %vm551_vm3 = vweird.f32 %v1273_v9  ;;  %vm552_vm5 = vweird.f32 %v1308_v13 }
 0x155   : > { %v549_v30 = vsub.f32 1.5, %v548_v11  ;;  %vm553_vm6 = vmor %vm551_vm3, %vm552_vm5  ;;  %vm581_vm7 = vweird.f32 %v1300_v56 }
 0x156   : > { %v564_v34 = vsel %vm1380_vm2, %v1282_v16, %v560_v0 }
 0x157   : > { %v593_v37 = vmul.f32 %v564_v34, %v1127_v12  ;;  %v550_v4 = vmul.f32 %v1308_v13, %v549_v30 }
 0x16e   : > { %v700_v57 = vpop.permute.xlu2 %699 }
 0x16f   : > { %v752_v61 = vmul.f32 %v700_v57, %v585_v49  ;;  %v490_v49 = vmul.f32 %v1253_v46, %v489_v14  ;;  %v569_v57 = vsub.f32 1.5, %v568_v25 }
 0x171   : > { %763 = vst.msk [vmem:[%s1267_s12] sm:$0xff] %vm429_vm1, %v752_v61  ;;  %v1349_v61 = vpop.eup %935  ;;  %v494_v20 = vsel %vm1336_vm8, %v1253_v46, %v490_v49 }
 0x172   : > { %v576_v46 = vmul.f32 %v1349_v61, %v1300_v56  ;;  %v586_v26 = vmul.f32 %v494_v20, %v1093_v42  ;;  %vm582_vm8 = vweird.f32 %v1349_v61 }
 0x173   : > { %vm583_vm9 = vmor %vm581_vm7, %vm582_vm8 }
 0x176   : > { %v715_v55 = vpop.permute.xlu2 %714 }
 0x177   : > { %v755_v5 = vmul.f32 %v715_v55, %v588_v62  ;;  %v570_v62 = vmul.f32 %v1279_v45, %v569_v57  ;;  %v577_v55 = vmul.f32 %v1349_v61, %v576_v46 }
 0x179   : > { %766 = vst.msk [vmem:[%s1267_s12 + $0x18] sm:$0xff] %vm429_vm1, %v755_v5  ;;  %v574_v1 = vsel %vm573_vm0, %v1279_v45, %v570_v62  ;;  %v590_v45 = vmul.f32 %v534_v31, %v1090_v39  ;;  %v578_v3 = vmul.f32 0.5, %v577_v55  ;;  %v554_v39 = vsel %vm553_vm6, %v1308_v13, %v550_v4 }
 0x17a   : > { %v594_v2 = vmul.f32 %v574_v1, %v1168_v43  ;;  %v592_v12 = vmul.f32 %v554_v39, %v1114_v63 }
 0x17b   : > { %v579_v8 = vsub.f32 1.5, %v578_v3 }
 0x17d   : > { %v580_v10 = vmul.f32 %v1349_v61, %v579_v8 }
 0x17e   : > { %v720_v27 = vpop.permute.xlu2 %719 }
 0x17f   : > { %v756_v48 = vmul.f32 %v720_v27, %v589_v23  ;;  %v584_v18 = vsel %vm583_vm9, %v1349_v61, %v580_v10 }
 0x180   : > { %v595_v28 = vmul.f32 %v584_v18, %v1197_v21 }
 0x181   : > { %767 = vst.msk [vmem:[%s1267_s12 + $0x20] sm:$0xff] %vm429_vm1, %v756_v48 }
 0x186   : > { %v730_v22 = vpop.permute.xlu2 %729  ;;  %v710_v58 = vpop.permute.xlu1 %709 }
 0x187   : > { %v758_v54 = vmul.f32 %v730_v22, %v591_v33  ;;  %v754_v17 = vmul.f32 %v710_v58, %v587_v40  ;;  %v705_v29 = vpop.permute.xlu0 %704 }
 0x188   : > { %v753_v42 = vmul.f32 %v705_v29, %v586_v26 }
 0x189   : > { %769 = vst.msk [vmem:[%s1267_s12 + $0x30] sm:$0xff] %vm429_vm1, %v758_v54 }
 0x18a   : > { %765 = vst.msk [vmem:[%s1267_s12 + $0x10] sm:$0xff] %vm429_vm1, %v754_v17 }
 0x18b   : > { %764 = vst.msk [vmem:[%s1267_s12 + $0x8] sm:$0xff] %vm429_vm1, %v753_v42 }
 0x18e   : > { %v745_v5 = vpop.permute.xlu2 %744  ;;  %v725_v32 = vpop.permute.xlu1 %724 }
 0x18f   : > { %v761_v6 = vmul.f32 %v745_v5, %v594_v2  ;;  %v757_v7 = vmul.f32 %v725_v32, %v590_v45  ;;  %v740_v16 = vpop.permute.xlu0 %739 }
 0x190   : > { %v760_v9 = vmul.f32 %v740_v16, %v593_v37 }
 0x191   : > { %772 = vst.msk [vmem:[%s1267_s12 + $0x48] sm:$0xff] %vm429_vm1, %v761_v6 }
 0x192   : > { %768 = vst.msk [vmem:[%s1267_s12 + $0x28] sm:$0xff] %vm429_vm1, %v757_v7 }
 0x193   : > { %771 = vst.msk [vmem:[%s1267_s12 + $0x40] sm:$0xff] %vm429_vm1, %v760_v9 }
 0x196   : > { %v735_v43 = vpop.permute.xlu1 %734 }
 0x197   : > { %v759_v14 = vmul.f32 %v735_v43, %v592_v12 }
 0x199   : > { %770 = vst.msk [vmem:[%s1267_s12 + $0x38] sm:$0xff] %vm429_vm1, %v759_v14 }
 0x19e   : > { %v750_v13 = vpop.permute.xlu1 %749 }
 0x19f   : > { %v762_v23 = vmul.f32 %v750_v13, %v595_v28 }
 0x1a1   : > { %773 = vst.msk [vmem:[%s1267_s12 + $0x50] sm:$0x1] %vm460_vm4, %v762_v23 }
 0x1a2 PF: > { %s17_s20 = sadd.s32 1, %s943_s20  }
 0x1a3   : > { %p14_p4 = scmp.ge.s32.totalorder %s17_s20, 4  }
 0x1a5   :  { %16 = sbr.rel (!%p14_p4) target bundleno = 3 (0x3), region = 70 }

// kernel: cc_alex_fcn4_forward.7
= control target key start
LH: loop header
LB: loop body
LE: loop exit
PB: predicated region body
PF: predicated region fallthrough
CT: control target
= control target key end

     0   :  { %s702_s15 = smov 0   ;;  %s992_s0 = inlined_call_operand.vmem [shape: f32[2,4,192], index: 0, kind: input, shape index: {}]   ;;  %s993_s1 = inlined_call_operand.vmem [shape: f32[192,3], index: 1, kind: input, shape index: {}]   ;;  %s994_s2 = inlined_call_operand.vmem [shape: f32[1,3], index: 2, kind: input, shape index: {}]   ;;  %s995_s3 = inlined_call_operand.vmem [shape: f32[256,4], index: 3, kind: input, shape index: {}]   ;;  %s996_s4 = inlined_call_operand.vmem [shape: f32[2,256,3], index: 4, kind: output, shape index: {}]  }
   0x1 LB: > { %s610_s16 = sadd.s32 4294967295, %s675_s15   ;;  %p614_p0 = scmp.ge.s32.totalorder %s675_s15, 1  ;;  %s675_s15 = sphi %s702_s15, %s14_s15  }
   0x2   : > { %p162_p1 = scmp.lt.s32.totalorder %s675_s15, 3 }
   0x4   : > { %p163_p2 = pnand %p614_p0, %p162_p1 }
   0x5   : > { %p188_p3 = scmp.lt.s32.totalorder (!%p163_p2), %s610_s16, 1 }
   0x6   : > { %166 = sbr.rel (%p163_p2) target bundleno = 383 (0x17f), region = 36 }
   0xb   : > { %v214_v0 = vld [vmem:[%s993_s1 + $0x78] sm:$0xff]  ;;  %v213_v1 = vld [vmem:[%s993_s1 + $0x70] sm:$0xff]  ;;  %v212_v2 = vld [vmem:[%s993_s1 + $0x68] sm:$0xff]  ;;  %s998_s16 = smov (!%p188_p3, %s610_s16), 1  ;;  %vm232_vm0 = vcmask 523264   ;;  %vm405_vm1 = vcmask 1043456  }
   0xc   : > { %235 = vmatpush.msra.mxu0 %v214_v0  ;;  %v222_v3 = vld [vmem:[%s993_s1 + $0xb8] sm:$0xff]  ;;  %v211_v4 = vld [vmem:[%s993_s1 + $0x60] sm:$0xff]  ;;  %v221_v5 = vld [vmem:[%s993_s1 + $0xb0] sm:$0xff]  ;;  %s655_s29 = sshll.u32 %s998_s16, 3  ;;  %vm308_vm2 = vcmask 31744   ;;  %s656_s13 = sshll.u32 %s998_s16, 8 }
   0xd   : > { %263 = vmatpush.msra.mxu1 %v222_v3  ;;  %v220_v6 = vld [vmem:[%s993_s1 + $0xa8] sm:$0xff]  ;;  %s192_s8 = scalar_lea.vmem %s992_s0, %s655_s29  ;;  %v210_v7 = vld [vmem:[%s993_s1 + $0x58] sm:$0xff]  ;;  %v219_v8 = vld [vmem:[%s993_s1 + $0xa0] sm:$0xff]  ;;  %s923_s18 = scalar_lea.vmem %s996_s4, %s656_s13  ;;  %vm522_vm3 = vcmask 23552  }
   0xe   : > { %236 = vmatpush.msra.mxu0 %v213_v1  ;;  %v198_v9 = vld [vmem:[%s192_s8] sm:$0xff]  ;;  %v209_v10 = vld [vmem:[%s993_s1 + $0x50] sm:$0xff]  ;;  %v218_v11 = vld [vmem:[%s993_s1 + $0x98] sm:$0xff] }
   0xf   : > { %264 = vmatpush.msra.mxu1 %v221_v5  ;;  %228 = vst [vmem:[#allocation1] ss:$2 sm:$0xff] %v198_v9  ;;  %v208_v12 = vld [vmem:[%s993_s1 + $0x48] sm:$0xff]  ;;  %v217_v13 = vld [vmem:[%s993_s1 + $0x90] sm:$0xff]  ;;  %v207_v14 = vld [vmem:[%s993_s1 + $0x40] sm:$0xff] }
  0x10   : > { %237 = vmatpush.msra.mxu0 %v212_v2  ;;  %v216_v15 = vld [vmem:[%s993_s1 + $0x88] sm:$0xff]  ;;  %v206_v16 = vld [vmem:[%s993_s1 + $0x38] sm:$0xff]  ;;  %v215_v17 = vld [vmem:[%s993_s1 + $0x80] sm:$0xff] }
  0x11   : > { %265 = vmatpush.msra.mxu1 %v220_v6  ;;  %v205_v18 = vld [vmem:[%s993_s1 + $0x30] sm:$0xff]  ;;  %v204_v20 = vld [vmem:[%s993_s1 + $0x28] sm:$0xff]  ;;  %v203_v21 = vld [vmem:[%s993_s1 + $0x20] sm:$0xff] }
  0x12   : > { %238 = vmatpush.msra.mxu0 %v211_v4  ;;  %v202_v22 = vld [vmem:[%s993_s1 + $0x18] sm:$0xff]  ;;  %v201_v23 = vld [vmem:[%s993_s1 + $0x10] sm:$0xff]  ;;  %v200_v24 = vld [vmem:[%s993_s1 + $0x8] sm:$0xff] }
  0x13   : > { %266 = vmatpush.msra.mxu1 %v219_v8  ;;  %v199_v25 = vld [vmem:[%s993_s1] sm:$0xff]  ;;  %v298_v34 = vld [vmem:[%s995_s3 + $0xb0] sm:$0xff]  ;;  %v289_v36 = vld [vmem:[%s995_s3 + $0x68] sm:$0xff] }
  0x14   : > { %239 = vmatpush.msra.mxu0 %v210_v7  ;;  %v668_v27 = vld [vmem:[%s994_s2] ss:$0 sm:$0xff]  ;;  %v299_v37 = vld [vmem:[%s995_s3 + $0xb8] sm:$0xff]  ;;  %v281_v38 = vld [vmem:[%s995_s3 + $0x28] sm:$0xff] }
  0x15   : > { %267 = vmatpush.msra.mxu1 %v218_v11  ;;  %v288_v33 = vld [vmem:[%s995_s3 + $0x60] sm:$0xff]  ;;  %v290_v39 = vld [vmem:[%s995_s3 + $0x70] sm:$0xff]  ;;  %v291_v43 = vld [vmem:[%s995_s3 + $0x78] sm:$0xff] }
  0x16   : > { %240 = vmatpush.msra.mxu0 %v209_v10  ;;  %v230_v19 = vld.sshfl [vmem:[#allocation1 + $0x8] sm:$0xff pattern:$0x75316420]  ;;  %v229_v26 = vld.sshfl [vmem:[#allocation1] sm:$0xff pattern:$0x75316420] }
  0x17   : > { %268 = vmatpush.msra.mxu1 %v217_v13  ;;  %v280_v35 = vld [vmem:[%s995_s3 + $0x20] sm:$0xff]  ;;  %v282_v41 = vld [vmem:[%s995_s3 + $0x30] sm:$0xff]  ;;  %v301_v44 = vld [vmem:[%s995_s3 + $0xc8] sm:$0xff] }
  0x18   : > { %241 = vmatpush.msra.mxu0 %v208_v12  ;;  %v300_v40 = vld [vmem:[%s995_s3 + $0xc0] sm:$0xff]  ;;  %v283_v45 = vld [vmem:[%s995_s3 + $0x38] sm:$0xff]  ;;  %v277_v46 = vld [vmem:[%s995_s3 + $0x8] sm:$0xff] }
  0x19   : > { %269 = vmatpush.msra.mxu1 %v216_v15  ;;  %v276_v42 = vld [vmem:[%s995_s3] sm:$0xff]  ;;  %v302_v48 = vld [vmem:[%s995_s3 + $0xd0] sm:$0xff]  ;;  %v293_v51 = vld [vmem:[%s995_s3 + $0x88] sm:$0xff] }
  0x1a   : > { %242 = vmatpush.msra.mxu0 %v207_v14  ;;  %v292_v47 = vld [vmem:[%s995_s3 + $0x80] sm:$0xff]  ;;  %v278_v50 = vld [vmem:[%s995_s3 + $0x10] sm:$0xff]  ;;  %v303_v52 = vld [vmem:[%s995_s3 + $0xd8] sm:$0xff] }
  0x1b   : > { %270 = vmatpush.msra.mxu1 %v215_v17  ;;  %v284_v49 = vld [vmem:[%s995_s3 + $0x40] sm:$0xff]  ;;  %v285_v53 = vld [vmem:[%s995_s3 + $0x48] sm:$0xff]  ;;  %v279_v54 = vld [vmem:[%s995_s3 + $0x18] sm:$0xff] }
  0x1c   : > { %243 = vmatpush.msra.mxu0 %v206_v16  ;;  %619 = vmatmul.msk.f32.vlgmr.msra.gmra.mxu1 %vm232_vm0, %v230_v19  ;;  %v294_v55 = vld [vmem:[%s995_s3 + $0x90] sm:$0xff]  ;;  %v304_v56 = vld [vmem:[%s995_s3 + $0xe0] sm:$0xff]  ;;  %v295_v58 = vld [vmem:[%s995_s3 + $0x98] sm:$0xff] }
  0x1d   : > { %v286_v57 = vld [vmem:[%s995_s3 + $0x50] sm:$0xff]  ;;  %v305_v59 = vld [vmem:[%s995_s3 + $0xe8] sm:$0xff]  ;;  %v287_v60 = vld [vmem:[%s995_s3 + $0x58] sm:$0xff] }
  0x1e   : > { %244 = vmatpush.msra.mxu0 %v205_v18  ;;  %v296_v61 = vld [vmem:[%s995_s3 + $0xa0] sm:$0xff]  ;;  %v306_v62 = vld [vmem:[%s995_s3 + $0xf0] sm:$0xff]  ;;  %v297_v63 = vld [vmem:[%s995_s3 + $0xa8] sm:$0xff] }
  0x1f   : > { %v307_v0 = vld [vmem:[%s995_s3 + $0xf8] sm:$0xff] }
  0x20   : > { %245 = vmatpush.msra.mxu0 %v204_v20 }
  0x22   : > { %246 = vmatpush.msra.mxu0 %v203_v21 }
  0x24   : > { %247 = vmatpush.msra.mxu0 %v202_v22 }
  0x26   : > { %248 = vmatpush.msra.mxu0 %v201_v23 }
  0x28   : > { %249 = vmatpush.msra.mxu0 %v200_v24 }
  0x2a   : > { %250 = vmatpush.msra.mxu0 %v199_v25 }
  0x2b   : > { %251 = vmatmul.f32.vlgmr.msra.gmra.mxu0 %v229_v26 }
  0x99   : > { %v272_v29 = vpop.f32.mrf.mxu1 }
  0xa8   : > { %v252_v28 = vpop.f32.mrf.mxu0 }
  0xa9   : > { %v253_v30 = vadd.f32 %v668_v27, %v252_v28 }
  0xab   : > { %v273_v31 = vadd.f32 %v272_v29, %v253_v30 }
  0xad   : > { %v275_v32 = vmax.f32 %v273_v31, 0.0 }
  0xaf   : > { %620 = vmatpush.msk.msrb.mxu0 %vm405_vm1, %v275_v32  ;;  %657 = vmatpush.msk.msrb.mxu1 %vm405_vm1, %v275_v32 }
  0xb0   : > { %658 = vmatpush.msk.msra.mxu2 %vm405_vm1, %v275_v32  ;;  %659 = vmatpush.msk.msra.mxu3 %vm405_vm1, %v275_v32 }
  0xb1   : > { %633 = vmatmul.msk.f32.vlgmr.msra.gmra.mxu2 %vm308_vm2, %v288_v33  ;;  %643 = vmatmul.msk.f32.vlgmr.msra.gmra.mxu3 %vm308_vm2, %v298_v34 }
  0xb2   : > { %625 = vmatmul.msk.f32.vlgmr.msrb.gmra.mxu1 %vm308_vm2, %v280_v35  ;;  %621 = vmatmul.msk.f32.vlgmr.msrb.gmra.mxu0 %vm308_vm2, %v276_v42 }
  0xb9   : > { %634 = vmatmul.msk.f32.gmra.mxu2 %vm308_vm2, %v289_v36  ;;  %644 = vmatmul.msk.f32.gmra.mxu3 %vm308_vm2, %v299_v37 }
  0xba   : > { %626 = vmatmul.msk.f32.gmra.mxu1 %vm308_vm2, %v281_v38  ;;  %622 = vmatmul.msk.f32.gmra.mxu0 %vm308_vm2, %v277_v46 }
  0xc1   : > { %635 = vmatmul.msk.f32.gmra.mxu2 %vm308_vm2, %v290_v39  ;;  %645 = vmatmul.msk.f32.gmra.mxu3 %vm308_vm2, %v300_v40 }
  0xc2   : > { %627 = vmatmul.msk.f32.gmra.mxu1 %vm308_vm2, %v282_v41  ;;  %623 = vmatmul.msk.f32.gmra.mxu0 %vm308_vm2, %v278_v50 }
  0xc9   : > { %636 = vmatmul.msk.f32.gmra.mxu2 %vm308_vm2, %v291_v43  ;;  %646 = vmatmul.msk.f32.gmra.mxu3 %vm308_vm2, %v301_v44 }
  0xca   : > { %628 = vmatmul.msk.f32.gmra.mxu1 %vm308_vm2, %v283_v45  ;;  %624 = vmatmul.msk.f32.gmra.mxu0 %vm308_vm2, %v279_v54 }
  0xd1   : > { %637 = vmatmul.msk.f32.gmra.mxu2 %vm308_vm2, %v292_v47  ;;  %647 = vmatmul.msk.f32.gmra.mxu3 %vm308_vm2, %v302_v48 }
  0xd2   : > { %629 = vmatmul.msk.f32.gmra.mxu1 %vm308_vm2, %v284_v49 }
  0xd9   : > { %638 = vmatmul.msk.f32.gmra.mxu2 %vm308_vm2, %v293_v51  ;;  %648 = vmatmul.msk.f32.gmra.mxu3 %vm308_vm2, %v303_v52 }
  0xda   : > { %630 = vmatmul.msk.f32.gmra.mxu1 %vm308_vm2, %v285_v53 }
  0xe1   : > { %639 = vmatmul.msk.f32.gmra.mxu2 %vm308_vm2, %v294_v55  ;;  %649 = vmatmul.msk.f32.gmra.mxu3 %vm308_vm2, %v304_v56 }
  0xe2   : > { %631 = vmatmul.msk.f32.gmra.mxu1 %vm308_vm2, %v286_v57 }
  0xe9   : > { %640 = vmatmul.msk.f32.gmra.mxu2 %vm308_vm2, %v295_v58  ;;  %650 = vmatmul.msk.f32.gmra.mxu3 %vm308_vm2, %v305_v59 }
  0xea   : > { %632 = vmatmul.msk.f32.gmra.mxu1 %vm308_vm2, %v287_v60 }
  0xf1   : > { %641 = vmatmul.msk.f32.gmra.mxu2 %vm308_vm2, %v296_v61  ;;  %651 = vmatmul.msk.f32.gmra.mxu3 %vm308_vm2, %v306_v62 }
  0xf9   : > { %642 = vmatmul.msk.f32.gmra.mxu2 %vm308_vm2, %v297_v63  ;;  %652 = vmatmul.msk.f32.gmra.mxu3 %vm308_vm2, %v307_v0 }
 0x12f   : > { %v438_v1 = vpop.f32.mrf.mxu1  ;;  %v426_v8 = vpop.f32.mrf.mxu0 }
 0x130   : > { %527 = vst.msk [vmem:[%s923_s18 + $0x20] sm:$0xff] %vm522_vm3, %v438_v1 }
 0x131   : > { %523 = vst.msk [vmem:[%s923_s18] sm:$0xff] %vm522_vm3, %v426_v8 }
 0x134   : > { %v462_v2 = vpop.f32.mrf.mxu2  ;;  %v492_v3 = vpop.f32.mrf.mxu3 }
 0x135   : > { %535 = vst.msk [vmem:[%s923_s18 + $0x60] sm:$0xff] %vm522_vm3, %v462_v2 }
 0x136   : > { %545 = vst.msk [vmem:[%s923_s18 + $0xb0] sm:$0xff] %vm522_vm3, %v492_v3 }
 0x137   : > { %v441_v4 = vpop.f32.mrf.mxu1  ;;  %v429_v12 = vpop.f32.mrf.mxu0 }
 0x138   : > { %528 = vst.msk [vmem:[%s923_s18 + $0x28] sm:$0xff] %vm522_vm3, %v441_v4 }
 0x139   : > { %524 = vst.msk [vmem:[%s923_s18 + $0x8] sm:$0xff] %vm522_vm3, %v429_v12 }
 0x13c   : > { %v465_v5 = vpop.f32.mrf.mxu2  ;;  %v495_v6 = vpop.f32.mrf.mxu3 }
 0x13d   : > { %536 = vst.msk [vmem:[%s923_s18 + $0x68] sm:$0xff] %vm522_vm3, %v465_v5 }
 0x13e   : > { %546 = vst.msk [vmem:[%s923_s18 + $0xb8] sm:$0xff] %vm522_vm3, %v495_v6 }
 0x13f   : > { %v444_v7 = vpop.f32.mrf.mxu1  ;;  %v432_v16 = vpop.f32.mrf.mxu0 }
 0x140   : > { %529 = vst.msk [vmem:[%s923_s18 + $0x30] sm:$0xff] %vm522_vm3, %v444_v7 }
 0x141   : > { %525 = vst.msk [vmem:[%s923_s18 + $0x10] sm:$0xff] %vm522_vm3, %v432_v16 }
 0x144   : > { %v468_v9 = vpop.f32.mrf.mxu2  ;;  %v498_v10 = vpop.f32.mrf.mxu3 }
 0x145   : > { %537 = vst.msk [vmem:[%s923_s18 + $0x70] sm:$0xff] %vm522_vm3, %v468_v9 }
 0x146   : > { %547 = vst.msk [vmem:[%s923_s18 + $0xc0] sm:$0xff] %vm522_vm3, %v498_v10 }
 0x147   : > { %v447_v11 = vpop.f32.mrf.mxu1  ;;  %v435_v20 = vpop.f32.mrf.mxu0 }
 0x148   : > { %530 = vst.msk [vmem:[%s923_s18 + $0x38] sm:$0xff] %vm522_vm3, %v447_v11 }
 0x149   : > { %526 = vst.msk [vmem:[%s923_s18 + $0x18] sm:$0xff] %vm522_vm3, %v435_v20 }
 0x14c   : > { %v471_v13 = vpop.f32.mrf.mxu2  ;;  %v501_v14 = vpop.f32.mrf.mxu3 }
 0x14d   : > { %538 = vst.msk [vmem:[%s923_s18 + $0x78] sm:$0xff] %vm522_vm3, %v471_v13 }
 0x14e   : > { %548 = vst.msk [vmem:[%s923_s18 + $0xc8] sm:$0xff] %vm522_vm3, %v501_v14 }
 0x14f   : > { %v450_v15 = vpop.f32.mrf.mxu1 }
 0x150   : > { %531 = vst.msk [vmem:[%s923_s18 + $0x40] sm:$0xff] %vm522_vm3, %v450_v15 }
 0x154   : > { %v474_v17 = vpop.f32.mrf.mxu2  ;;  %v504_v18 = vpop.f32.mrf.mxu3 }
 0x155   : > { %539 = vst.msk [vmem:[%s923_s18 + $0x80] sm:$0xff] %vm522_vm3, %v474_v17 }
 0x156   : > { %549 = vst.msk [vmem:[%s923_s18 + $0xd0] sm:$0xff] %vm522_vm3, %v504_v18 }
 0x157   : > { %v453_v19 = vpop.f32.mrf.mxu1 }
 0x158   : > { %532 = vst.msk [vmem:[%s923_s18 + $0x48] sm:$0xff] %vm522_vm3, %v453_v19 }
 0x15c   : > { %v477_v21 = vpop.f32.mrf.mxu2  ;;  %v507_v22 = vpop.f32.mrf.mxu3 }
 0x15d   : > { %540 = vst.msk [vmem:[%s923_s18 + $0x88] sm:$0xff] %vm522_vm3, %v477_v21 }
 0x15e   : > { %550 = vst.msk [vmem:[%s923_s18 + $0xd8] sm:$0xff] %vm522_vm3, %v507_v22 }
 0x15f   : > { %v456_v23 = vpop.f32.mrf.mxu1 }
 0x160   : > { %533 = vst.msk [vmem:[%s923_s18 + $0x50] sm:$0xff] %vm522_vm3, %v456_v23 }
 0x164   : > { %v480_v24 = vpop.f32.mrf.mxu2  ;;  %v510_v25 = vpop.f32.mrf.mxu3 }
 0x165   : > { %541 = vst.msk [vmem:[%s923_s18 + $0x90] sm:$0xff] %vm522_vm3, %v480_v24 }
 0x166   : > { %551 = vst.msk [vmem:[%s923_s18 + $0xe0] sm:$0xff] %vm522_vm3, %v510_v25 }
 0x167   : > { %v459_v26 = vpop.f32.mrf.mxu1 }
 0x168   : > { %534 = vst.msk [vmem:[%s923_s18 + $0x58] sm:$0xff] %vm522_vm3, %v459_v26 }
 0x16c   : > { %v483_v27 = vpop.f32.mrf.mxu2  ;;  %v513_v28 = vpop.f32.mrf.mxu3 }
 0x16d   : > { %542 = vst.msk [vmem:[%s923_s18 + $0x98] sm:$0xff] %vm522_vm3, %v483_v27 }
 0x16e   : > { %552 = vst.msk [vmem:[%s923_s18 + $0xe8] sm:$0xff] %vm522_vm3, %v513_v28 }
 0x174   : > { %v486_v29 = vpop.f32.mrf.mxu2  ;;  %v516_v30 = vpop.f32.mrf.mxu3 }
 0x175   : > { %543 = vst.msk [vmem:[%s923_s18 + $0xa0] sm:$0xff] %vm522_vm3, %v486_v29 }
 0x176   : > { %553 = vst.msk [vmem:[%s923_s18 + $0xf0] sm:$0xff] %vm522_vm3, %v516_v30 }
 0x17c   : > { %v489_v31 = vpop.f32.mrf.mxu2  ;;  %v519_v32 = vpop.f32.mrf.mxu3 }
 0x17d   : > { %544 = vst.msk [vmem:[%s923_s18 + $0xa8] sm:$0xff] %vm522_vm3, %v489_v31 }
 0x17e   : > { %554 = vst.msk [vmem:[%s923_s18 + $0xf8] sm:$0xff] %vm522_vm3, %v519_v32 }
 0x17f PF: > { %s14_s15 = sadd.s32 1, %s675_s15  }
 0x180   : > { %p11_p4 = scmp.ge.s32.totalorder %s14_s15, 4  }
 0x182   :  { %13 = sbr.rel (!%p11_p4) target bundleno = 1 (0x1), region = 66 }

</bundles_post_ra>
